<compile_context>
chip_gen: v5e
topology: v5e:2x2
jax: 0.10.0
libtpu: 0.0.40
codegen_flags: <defaults>
</compile_context>

<pallas_src>
import functools

import numpy as np

import jax
import jax.numpy as jnp
from jax.experimental import pallas as pl
from jax.experimental.pallas import tpu as pltpu


# Static network configuration (kept OUT of any traced pytree).
CONV_CFGS = (
    # (cin, cout, kernel, stride, pad)
    (1, 8, 5, 2, 2),
    (8, 16, 3, 2, 1),
    (16, 32, 3, 2, 1),
    (32, 64, 3, 2, 1),
)
NUM_LAYERS = len(CONV_CFGS)
LANE = 128


def _out_size(n, k, s, p):
    return (n + 2 * p - k) // s + 1


# ---------------------------------------------------------------------------
# Fused Pallas kernel: full forward pass for one batch element per grid step.
# ---------------------------------------------------------------------------
def _fused_cnn_kernel(*refs):
    x_ref = refs[0]
    o_ref = refs[-1]
    fc_w_ref, fc_b_ref = refs[-3], refs[-2]
    layer_refs = refs[1:-3]

    h = x_ref[0].astype(jnp.float32)                  # (H, W*Cin), Cin == 1

    for li in range(0, 4 * NUM_LAYERS, 4):            # static unroll over layers
        r_ref, m_ref, bias_ref, shift_ref = layer_refs[li:li + 4]
        kh = r_ref.shape[0]
        oh = r_ref.shape[1]
        owc = m_ref.shape[2]
        acc = jnp.zeros((oh, owc), jnp.float32)
        for i in range(kh):                           # static unroll over kernel rows
            rows = jnp.dot(r_ref[i], h, preferred_element_type=jnp.float32)
            acc = acc + jnp.dot(rows, m_ref[i],
                                preferred_element_type=jnp.float32)
        # conv bias (BN scale pre-folded) -> ReLU -> BN shift
        h = jnp.maximum(acc + bias_ref[...], 0.0) + shift_ref[...]

    # AdaptiveAvgPool2d(1) + Linear (pool scaling / channel fold in fc_w).
    pooled = jnp.sum(h, axis=0, keepdims=True)        # (1, OW*C)
    logits = jnp.dot(pooled, fc_w_ref[...],
                     preferred_element_type=jnp.float32) + fc_b_ref[...]
    o_ref[0] = logits                                 # lane-dense (1, 128) store


def _const_spec(shape):
    """Full-array VMEM-resident block (block == full dims, constant index)."""
    zeros = (0,) * len(shape)
    return pl.BlockSpec(shape, lambda b, _z=zeros: _z)


@functools.partial(jax.jit, static_argnames=("num_classes",))
def cnn_model_forward(kparams, x, num_classes):
    """x: (B, H, W) -- channel axis is added implicitly (Cin = 1 layout)."""
    B, H, W = x.shape
    x = x.astype(jnp.float32)

    operands = [x]
    in_specs = [pl.BlockSpec((1, H, W), lambda b: (b, 0, 0))]
    for layer in kparams["layers"]:
        for name in ("R", "M", "bias", "shift"):
            arr = layer[name]
            operands.append(arr)
            in_specs.append(_const_spec(arr.shape))
    for name in ("fc_w", "fc_b"):
        arr = kparams[name]
        operands.append(arr)
        in_specs.append(_const_spec(arr.shape))

    ncpad = kparams["fc_w"].shape[1]
    out = pl.pallas_call(
        _fused_cnn_kernel,
        grid=(B,),
        in_specs=in_specs,
        out_specs=pl.BlockSpec((1, 1, ncpad), lambda b: (b, 0, 0)),
        out_shape=jax.ShapeDtypeStruct((B, 1, ncpad), jnp.float32),
        compiler_params=pltpu.CompilerParams(
            dimension_semantics=("parallel",)),       # v7x: split batch across TCs
    )(*operands)
    return out[:, 0, :num_classes]


# ---------------------------------------------------------------------------
# One-time parameter preprocessing (offline in a real deployment):
# fold BN / padding / stride / pooling into banded matmul operators.
# ---------------------------------------------------------------------------
def build_kernel_params(params, height, width, num_classes, eps=1e-5):
    layers = []
    h_in, w_in = height, width
    for (cin, cout, k, s, pad), p in zip(CONV_CFGS, params["convs"]):
        oh = _out_size(h_in, k, s, pad)
        ow = _out_size(w_in, k, s, pad)
        bn = p["bn"]
        scale = bn["gamma"] * jax.lax.rsqrt(bn["var"] + eps)
        shift = bn["beta"] - bn["mean"] * scale
        # Fold BN scale into conv weight & bias (scale > 0 => commutes with ReLU).
        w_eff = p["w"] * scale[:, None, None, None]           # (cout, cin, k, k)
        bias_eff = p["b"] * scale
        wt = jnp.transpose(w_eff, (2, 3, 1, 0))               # (kh, kw, cin, cout)

        # R[i, oh_, h] = 1 iff h == s*oh_ + i - pad   (row taps, stride, zero pad)
        R = np.zeros((k, oh, h_in), np.float32)
        # P[j, w, ow_] = 1 iff w == s*ow_ + j - pad   (col taps, stride, zero pad)
        P = np.zeros((k, w_in, ow), np.float32)
        for t in range(k):
            for o in range(oh):
                hh = s * o + t - pad
                if 0 <= hh < h_in:
                    R[t, o, hh] = 1.0
            for o in range(ow):
                ww = s * o + t - pad
                if 0 <= ww < w_in:
                    P[t, ww, o] = 1.0

        # Banded operator: M[i, w*cin+ci, ow*cout+co] = W_eff[co, ci, i, w - s*ow + pad]
        M = jnp.einsum("jwo,ijcd->iwcod", P, wt).reshape(k, w_in * cin, ow * cout)
        layers.append(dict(
            R=jnp.asarray(R),
            M=M.astype(jnp.float32),
            bias=jnp.tile(bias_eff, ow)[None, :].astype(jnp.float32),
            shift=jnp.tile(shift, ow)[None, :].astype(jnp.float32),
        ))
        h_in, w_in = oh, ow

    # Head: AdaptiveAvgPool2d(1) + Linear folded into one (OW*C, 128) matrix.
    c_last = CONV_CFGS[-1][1]
    ncpad = ((num_classes + LANE - 1) // LANE) * LANE
    fc_w_eff = jnp.tile(params["fc_w"].T / float(h_in * w_in), (w_in, 1))
    fc_w = jnp.zeros((w_in * c_last, ncpad), jnp.float32).at[:, :num_classes].set(fc_w_eff)
    fc_b = jnp.zeros((1, ncpad), jnp.float32).at[:, :num_classes].set(params["fc_b"])
    return dict(layers=layers, fc_w=fc_w, fc_b=fc_b)


# ---------------------------------------------------------------------------
# Deterministic PyTorch-like parameter init.
# ---------------------------------------------------------------------------
def init_params(key, num_classes):
    params = {"convs": []}
    for cin, cout, k, _s, _p in CONV_CFGS:
        key, kw_, kb_ = jax.random.split(key, 3)
        bound = 1.0 / float(np.sqrt(cin * k * k))
        params["convs"].append(dict(
            w=jax.random.uniform(kw_, (cout, cin, k, k), jnp.float32, -bound, bound),
            b=jax.random.uniform(kb_, (cout,), jnp.float32, -bound, bound),
            bn=dict(
                gamma=jnp.ones((cout,), jnp.float32),
                beta=jnp.zeros((cout,), jnp.float32),
                mean=jnp.zeros((cout,), jnp.float32),
                var=jnp.ones((cout,), jnp.float32),
            ),
        ))
    key, kw_, kb_ = jax.random.split(key, 3)
    bound = 1.0 / float(np.sqrt(64.0))
    params["fc_w"] = jax.random.uniform(kw_, (num_classes, 64), jnp.float32, -bound, bound)
    params["fc_b"] = jax.random.uniform(kb_, (num_classes,), jnp.float32, -bound, bound)
    return params


if __name__ == "__main__":
    num_classes = 10
    B, H, W = 2, 16, 16

    key = jax.random.PRNGKey(0)
    key_x, key_p = jax.random.split(key)
    x = jax.random.normal(key_x, (B, H, W), dtype=jnp.float32)
    params = init_params(key_p, num_classes)

    # One-time weight preprocessing, then the single fused kernel call.
    kparams = build_kernel_params(params, H, W, num_classes)
    out = cnn_model_forward(kparams, x, num_classes=num_classes)
    out = jax.block_until_ready(out)

    assert out.shape == (B, num_classes), out.shape
    assert bool(jnp.all(jnp.isfinite(out)))
    print("KERNEL_OK")
</pallas_src>

<mosaic_0001>
module attributes {stable_mosaic.version = 11 : i64} {
  func.func @_fused_cnn_kernel(%arg0: i32, %arg1: memref<1x16x16xf32, #tpu.memory_space<vmem>>, %arg2: memref<5x8x16xf32, #tpu.memory_space<vmem>>, %arg3: memref<5x16x64xf32, #tpu.memory_space<vmem>>, %arg4: memref<1x64xf32, #tpu.memory_space<vmem>>, %arg5: memref<1x64xf32, #tpu.memory_space<vmem>>, %arg6: memref<3x4x8xf32, #tpu.memory_space<vmem>>, %arg7: memref<3x64x64xf32, #tpu.memory_space<vmem>>, %arg8: memref<1x64xf32, #tpu.memory_space<vmem>>, %arg9: memref<1x64xf32, #tpu.memory_space<vmem>>, %arg10: memref<3x2x4xf32, #tpu.memory_space<vmem>>, %arg11: memref<3x64x64xf32, #tpu.memory_space<vmem>>, %arg12: memref<1x64xf32, #tpu.memory_space<vmem>>, %arg13: memref<1x64xf32, #tpu.memory_space<vmem>>, %arg14: memref<3x1x2xf32, #tpu.memory_space<vmem>>, %arg15: memref<3x64x64xf32, #tpu.memory_space<vmem>>, %arg16: memref<1x64xf32, #tpu.memory_space<vmem>>, %arg17: memref<1x64xf32, #tpu.memory_space<vmem>>, %arg18: memref<64x128xf32, #tpu.memory_space<vmem>>, %arg19: memref<1x128xf32, #tpu.memory_space<vmem>>, %arg20: memref<1x1x128xf32, #tpu.memory_space<vmem>>) attributes {dimension_semantics = [#tpu.dimension_semantics<parallel>], iteration_bounds = array<i64: 2>, scalar_prefetch = 0 : i64, scratch_operands = 0 : i64, tpu.core_type = #tpu.core_type<tc>, window_params = [{transform_indices = @transform_0, window_bounds = array<i64: 1, 16, 16>}, {pipeline_mode = #tpu.pipeline_mode<synchronous>, transform_indices = @transform_1, window_bounds = array<i64: 5, 8, 16>}, {pipeline_mode = #tpu.pipeline_mode<synchronous>, transform_indices = @transform_2, window_bounds = array<i64: 5, 16, 64>}, {pipeline_mode = #tpu.pipeline_mode<synchronous>, transform_indices = @transform_3, window_bounds = array<i64: 1, 64>}, {pipeline_mode = #tpu.pipeline_mode<synchronous>, transform_indices = @transform_4, window_bounds = array<i64: 1, 64>}, {pipeline_mode = #tpu.pipeline_mode<synchronous>, transform_indices = @transform_5, window_bounds = array<i64: 3, 4, 8>}, {pipeline_mode = #tpu.pipeline_mode<synchronous>, transform_indices = @transform_6, window_bounds = array<i64: 3, 64, 64>}, {pipeline_mode = #tpu.pipeline_mode<synchronous>, transform_indices = @transform_7, window_bounds = array<i64: 1, 64>}, {pipeline_mode = #tpu.pipeline_mode<synchronous>, transform_indices = @transform_8, window_bounds = array<i64: 1, 64>}, {pipeline_mode = #tpu.pipeline_mode<synchronous>, transform_indices = @transform_9, window_bounds = array<i64: 3, 2, 4>}, {pipeline_mode = #tpu.pipeline_mode<synchronous>, transform_indices = @transform_10, window_bounds = array<i64: 3, 64, 64>}, {pipeline_mode = #tpu.pipeline_mode<synchronous>, transform_indices = @transform_11, window_bounds = array<i64: 1, 64>}, {pipeline_mode = #tpu.pipeline_mode<synchronous>, transform_indices = @transform_12, window_bounds = array<i64: 1, 64>}, {pipeline_mode = #tpu.pipeline_mode<synchronous>, transform_indices = @transform_13, window_bounds = array<i64: 3, 1, 2>}, {pipeline_mode = #tpu.pipeline_mode<synchronous>, transform_indices = @transform_14, window_bounds = array<i64: 3, 64, 64>}, {pipeline_mode = #tpu.pipeline_mode<synchronous>, transform_indices = @transform_15, window_bounds = array<i64: 1, 64>}, {pipeline_mode = #tpu.pipeline_mode<synchronous>, transform_indices = @transform_16, window_bounds = array<i64: 1, 64>}, {pipeline_mode = #tpu.pipeline_mode<synchronous>, transform_indices = @transform_17, window_bounds = array<i64: 64, 128>}, {pipeline_mode = #tpu.pipeline_mode<synchronous>, transform_indices = @transform_18, window_bounds = array<i64: 1, 128>}, {transform_indices = @transform_19, window_bounds = array<i64: 1, 1, 128>}]} {
    %c0 = arith.constant 0 : index
    %c0_0 = arith.constant 0 : index
    %c0_1 = arith.constant 0 : index
    %0 = vector.load %arg1[%c0, %c0_0, %c0_1] : memref<1x16x16xf32, #tpu.memory_space<vmem>>, vector<1x16x16xf32>
    %1 = vector.shape_cast %0 : vector<1x16x16xf32> to vector<16x16xf32>
    %cst = arith.constant 0.000000e+00 : f32
    %2 = vector.broadcast %cst : f32 to vector<8x64xf32>
    %c0_2 = arith.constant 0 : index
    %c0_3 = arith.constant 0 : index
    %c0_4 = arith.constant 0 : index
    %3 = vector.load %arg2[%c0_2, %c0_3, %c0_4] : memref<5x8x16xf32, #tpu.memory_space<vmem>>, vector<1x8x16xf32>
    %4 = vector.shape_cast %3 : vector<1x8x16xf32> to vector<8x16xf32>
    %cst_5 = arith.constant dense<0.000000e+00> : vector<8x16xf32>
    %5 = tpu.matmul %4, %1, %cst_5 {dimension_numbers = #tpu.dot_dimension_numbers<[1], [0], [0], [1], [0, 0, 1, 1], [], []>} : vector<8x16xf32>, vector<16x16xf32>, vector<8x16xf32> -> vector<8x16xf32>
    %c0_6 = arith.constant 0 : index
    %c0_7 = arith.constant 0 : index
    %c0_8 = arith.constant 0 : index
    %6 = vector.load %arg3[%c0_6, %c0_7, %c0_8] : memref<5x16x64xf32, #tpu.memory_space<vmem>>, vector<1x16x64xf32>
    %7 = vector.shape_cast %6 : vector<1x16x64xf32> to vector<16x64xf32>
    %cst_9 = arith.constant dense<0.000000e+00> : vector<8x64xf32>
    %8 = tpu.matmul %5, %7, %cst_9 {dimension_numbers = #tpu.dot_dimension_numbers<[1], [0], [0], [1], [0, 0, 1, 1], [], []>} : vector<8x16xf32>, vector<16x64xf32>, vector<8x64xf32> -> vector<8x64xf32>
    %9 = arith.addf %2, %8 : vector<8x64xf32>
    %c1 = arith.constant 1 : index
    %c0_10 = arith.constant 0 : index
    %c0_11 = arith.constant 0 : index
    %10 = vector.load %arg2[%c1, %c0_10, %c0_11] : memref<5x8x16xf32, #tpu.memory_space<vmem>>, vector<1x8x16xf32>
    %11 = vector.shape_cast %10 : vector<1x8x16xf32> to vector<8x16xf32>
    %cst_12 = arith.constant dense<0.000000e+00> : vector<8x16xf32>
    %12 = tpu.matmul %11, %1, %cst_12 {dimension_numbers = #tpu.dot_dimension_numbers<[1], [0], [0], [1], [0, 0, 1, 1], [], []>} : vector<8x16xf32>, vector<16x16xf32>, vector<8x16xf32> -> vector<8x16xf32>
    %c1_13 = arith.constant 1 : index
    %c0_14 = arith.constant 0 : index
    %c0_15 = arith.constant 0 : index
    %13 = vector.load %arg3[%c1_13, %c0_14, %c0_15] : memref<5x16x64xf32, #tpu.memory_space<vmem>>, vector<1x16x64xf32>
    %14 = vector.shape_cast %13 : vector<1x16x64xf32> to vector<16x64xf32>
    %cst_16 = arith.constant dense<0.000000e+00> : vector<8x64xf32>
    %15 = tpu.matmul %12, %14, %cst_16 {dimension_numbers = #tpu.dot_dimension_numbers<[1], [0], [0], [1], [0, 0, 1, 1], [], []>} : vector<8x16xf32>, vector<16x64xf32>, vector<8x64xf32> -> vector<8x64xf32>
    %16 = arith.addf %9, %15 : vector<8x64xf32>
    %c2 = arith.constant 2 : index
    %c0_17 = arith.constant 0 : index
    %c0_18 = arith.constant 0 : index
    %17 = vector.load %arg2[%c2, %c0_17, %c0_18] : memref<5x8x16xf32, #tpu.memory_space<vmem>>, vector<1x8x16xf32>
    %18 = vector.shape_cast %17 : vector<1x8x16xf32> to vector<8x16xf32>
    %cst_19 = arith.constant dense<0.000000e+00> : vector<8x16xf32>
    %19 = tpu.matmul %18, %1, %cst_19 {dimension_numbers = #tpu.dot_dimension_numbers<[1], [0], [0], [1], [0, 0, 1, 1], [], []>} : vector<8x16xf32>, vector<16x16xf32>, vector<8x16xf32> -> vector<8x16xf32>
    %c2_20 = arith.constant 2 : index
    %c0_21 = arith.constant 0 : index
    %c0_22 = arith.constant 0 : index
    %20 = vector.load %arg3[%c2_20, %c0_21, %c0_22] : memref<5x16x64xf32, #tpu.memory_space<vmem>>, vector<1x16x64xf32>
    %21 = vector.shape_cast %20 : vector<1x16x64xf32> to vector<16x64xf32>
    %cst_23 = arith.constant dense<0.000000e+00> : vector<8x64xf32>
    %22 = tpu.matmul %19, %21, %cst_23 {dimension_numbers = #tpu.dot_dimension_numbers<[1], [0], [0], [1], [0, 0, 1, 1], [], []>} : vector<8x16xf32>, vector<16x64xf32>, vector<8x64xf32> -> vector<8x64xf32>
    %23 = arith.addf %16, %22 : vector<8x64xf32>
    %c3 = arith.constant 3 : index
    %c0_24 = arith.constant 0 : index
    %c0_25 = arith.constant 0 : index
    %24 = vector.load %arg2[%c3, %c0_24, %c0_25] : memref<5x8x16xf32, #tpu.memory_space<vmem>>, vector<1x8x16xf32>
    %25 = vector.shape_cast %24 : vector<1x8x16xf32> to vector<8x16xf32>
    %cst_26 = arith.constant dense<0.000000e+00> : vector<8x16xf32>
    %26 = tpu.matmul %25, %1, %cst_26 {dimension_numbers = #tpu.dot_dimension_numbers<[1], [0], [0], [1], [0, 0, 1, 1], [], []>} : vector<8x16xf32>, vector<16x16xf32>, vector<8x16xf32> -> vector<8x16xf32>
    %c3_27 = arith.constant 3 : index
    %c0_28 = arith.constant 0 : index
    %c0_29 = arith.constant 0 : index
    %27 = vector.load %arg3[%c3_27, %c0_28, %c0_29] : memref<5x16x64xf32, #tpu.memory_space<vmem>>, vector<1x16x64xf32>
    %28 = vector.shape_cast %27 : vector<1x16x64xf32> to vector<16x64xf32>
    %cst_30 = arith.constant dense<0.000000e+00> : vector<8x64xf32>
    %29 = tpu.matmul %26, %28, %cst_30 {dimension_numbers = #tpu.dot_dimension_numbers<[1], [0], [0], [1], [0, 0, 1, 1], [], []>} : vector<8x16xf32>, vector<16x64xf32>, vector<8x64xf32> -> vector<8x64xf32>
    %30 = arith.addf %23, %29 : vector<8x64xf32>
    %c4 = arith.constant 4 : index
    %c0_31 = arith.constant 0 : index
    %c0_32 = arith.constant 0 : index
    %31 = vector.load %arg2[%c4, %c0_31, %c0_32] : memref<5x8x16xf32, #tpu.memory_space<vmem>>, vector<1x8x16xf32>
    %32 = vector.shape_cast %31 : vector<1x8x16xf32> to vector<8x16xf32>
    %cst_33 = arith.constant dense<0.000000e+00> : vector<8x16xf32>
    %33 = tpu.matmul %32, %1, %cst_33 {dimension_numbers = #tpu.dot_dimension_numbers<[1], [0], [0], [1], [0, 0, 1, 1], [], []>} : vector<8x16xf32>, vector<16x16xf32>, vector<8x16xf32> -> vector<8x16xf32>
    %c4_34 = arith.constant 4 : index
    %c0_35 = arith.constant 0 : index
    %c0_36 = arith.constant 0 : index
    %34 = vector.load %arg3[%c4_34, %c0_35, %c0_36] : memref<5x16x64xf32, #tpu.memory_space<vmem>>, vector<1x16x64xf32>
    %35 = vector.shape_cast %34 : vector<1x16x64xf32> to vector<16x64xf32>
    %cst_37 = arith.constant dense<0.000000e+00> : vector<8x64xf32>
    %36 = tpu.matmul %33, %35, %cst_37 {dimension_numbers = #tpu.dot_dimension_numbers<[1], [0], [0], [1], [0, 0, 1, 1], [], []>} : vector<8x16xf32>, vector<16x64xf32>, vector<8x64xf32> -> vector<8x64xf32>
    %37 = arith.addf %30, %36 : vector<8x64xf32>
    %c0_38 = arith.constant 0 : index
    %c0_39 = arith.constant 0 : index
    %38 = vector.load %arg4[%c0_38, %c0_39] : memref<1x64xf32, #tpu.memory_space<vmem>>, vector<1x64xf32>
    %39 = vector.broadcast %38 : vector<1x64xf32> to vector<8x64xf32>
    %40 = arith.addf %37, %39 : vector<8x64xf32>
    %cst_40 = arith.constant 0.000000e+00 : f32
    %41 = vector.broadcast %cst_40 : f32 to vector<8x64xf32>
    %42 = arith.maximumf %40, %41 : vector<8x64xf32>
    %c0_41 = arith.constant 0 : index
    %c0_42 = arith.constant 0 : index
    %43 = vector.load %arg5[%c0_41, %c0_42] : memref<1x64xf32, #tpu.memory_space<vmem>>, vector<1x64xf32>
    %44 = vector.broadcast %43 : vector<1x64xf32> to vector<8x64xf32>
    %45 = arith.addf %42, %44 : vector<8x64xf32>
    %cst_43 = arith.constant 0.000000e+00 : f32
    %46 = vector.broadcast %cst_43 : f32 to vector<4x64xf32>
    %c0_44 = arith.constant 0 : index
    %c0_45 = arith.constant 0 : index
    %c0_46 = arith.constant 0 : index
    %47 = vector.load %arg6[%c0_44, %c0_45, %c0_46] : memref<3x4x8xf32, #tpu.memory_space<vmem>>, vector<1x4x8xf32>
    %48 = vector.shape_cast %47 : vector<1x4x8xf32> to vector<4x8xf32>
    %cst_47 = arith.constant dense<0.000000e+00> : vector<4x64xf32>
    %49 = tpu.matmul %48, %45, %cst_47 {dimension_numbers = #tpu.dot_dimension_numbers<[1], [0], [0], [1], [0, 0, 1, 1], [], []>} : vector<4x8xf32>, vector<8x64xf32>, vector<4x64xf32> -> vector<4x64xf32>
    %c0_48 = arith.constant 0 : index
    %c0_49 = arith.constant 0 : index
    %c0_50 = arith.constant 0 : index
    %50 = vector.load %arg7[%c0_48, %c0_49, %c0_50] : memref<3x64x64xf32, #tpu.memory_space<vmem>>, vector<1x64x64xf32>
    %51 = vector.shape_cast %50 : vector<1x64x64xf32> to vector<64x64xf32>
    %cst_51 = arith.constant dense<0.000000e+00> : vector<4x64xf32>
    %52 = tpu.matmul %49, %51, %cst_51 {dimension_numbers = #tpu.dot_dimension_numbers<[1], [0], [0], [1], [0, 0, 1, 1], [], []>} : vector<4x64xf32>, vector<64x64xf32>, vector<4x64xf32> -> vector<4x64xf32>
    %53 = arith.addf %46, %52 : vector<4x64xf32>
    %c1_52 = arith.constant 1 : index
    %c0_53 = arith.constant 0 : index
    %c0_54 = arith.constant 0 : index
    %54 = vector.load %arg6[%c1_52, %c0_53, %c0_54] : memref<3x4x8xf32, #tpu.memory_space<vmem>>, vector<1x4x8xf32>
    %55 = vector.shape_cast %54 : vector<1x4x8xf32> to vector<4x8xf32>
    %cst_55 = arith.constant dense<0.000000e+00> : vector<4x64xf32>
    %56 = tpu.matmul %55, %45, %cst_55 {dimension_numbers = #tpu.dot_dimension_numbers<[1], [0], [0], [1], [0, 0, 1, 1], [], []>} : vector<4x8xf32>, vector<8x64xf32>, vector<4x64xf32> -> vector<4x64xf32>
    %c1_56 = arith.constant 1 : index
    %c0_57 = arith.constant 0 : index
    %c0_58 = arith.constant 0 : index
    %57 = vector.load %arg7[%c1_56, %c0_57, %c0_58] : memref<3x64x64xf32, #tpu.memory_space<vmem>>, vector<1x64x64xf32>
    %58 = vector.shape_cast %57 : vector<1x64x64xf32> to vector<64x64xf32>
    %cst_59 = arith.constant dense<0.000000e+00> : vector<4x64xf32>
    %59 = tpu.matmul %56, %58, %cst_59 {dimension_numbers = #tpu.dot_dimension_numbers<[1], [0], [0], [1], [0, 0, 1, 1], [], []>} : vector<4x64xf32>, vector<64x64xf32>, vector<4x64xf32> -> vector<4x64xf32>
    %60 = arith.addf %53, %59 : vector<4x64xf32>
    %c2_60 = arith.constant 2 : index
    %c0_61 = arith.constant 0 : index
    %c0_62 = arith.constant 0 : index
    %61 = vector.load %arg6[%c2_60, %c0_61, %c0_62] : memref<3x4x8xf32, #tpu.memory_space<vmem>>, vector<1x4x8xf32>
    %62 = vector.shape_cast %61 : vector<1x4x8xf32> to vector<4x8xf32>
    %cst_63 = arith.constant dense<0.000000e+00> : vector<4x64xf32>
    %63 = tpu.matmul %62, %45, %cst_63 {dimension_numbers = #tpu.dot_dimension_numbers<[1], [0], [0], [1], [0, 0, 1, 1], [], []>} : vector<4x8xf32>, vector<8x64xf32>, vector<4x64xf32> -> vector<4x64xf32>
    %c2_64 = arith.constant 2 : index
    %c0_65 = arith.constant 0 : index
    %c0_66 = arith.constant 0 : index
    %64 = vector.load %arg7[%c2_64, %c0_65, %c0_66] : memref<3x64x64xf32, #tpu.memory_space<vmem>>, vector<1x64x64xf32>
    %65 = vector.shape_cast %64 : vector<1x64x64xf32> to vector<64x64xf32>
    %cst_67 = arith.constant dense<0.000000e+00> : vector<4x64xf32>
    %66 = tpu.matmul %63, %65, %cst_67 {dimension_numbers = #tpu.dot_dimension_numbers<[1], [0], [0], [1], [0, 0, 1, 1], [], []>} : vector<4x64xf32>, vector<64x64xf32>, vector<4x64xf32> -> vector<4x64xf32>
    %67 = arith.addf %60, %66 : vector<4x64xf32>
    %c0_68 = arith.constant 0 : index
    %c0_69 = arith.constant 0 : index
    %68 = vector.load %arg8[%c0_68, %c0_69] : memref<1x64xf32, #tpu.memory_space<vmem>>, vector<1x64xf32>
    %69 = vector.broadcast %68 : vector<1x64xf32> to vector<4x64xf32>
    %70 = arith.addf %67, %69 : vector<4x64xf32>
    %cst_70 = arith.constant 0.000000e+00 : f32
    %71 = vector.broadcast %cst_70 : f32 to vector<4x64xf32>
    %72 = arith.maximumf %70, %71 : vector<4x64xf32>
    %c0_71 = arith.constant 0 : index
    %c0_72 = arith.constant 0 : index
    %73 = vector.load %arg9[%c0_71, %c0_72] : memref<1x64xf32, #tpu.memory_space<vmem>>, vector<1x64xf32>
    %74 = vector.broadcast %73 : vector<1x64xf32> to vector<4x64xf32>
    %75 = arith.addf %72, %74 : vector<4x64xf32>
    %cst_73 = arith.constant 0.000000e+00 : f32
    %76 = vector.broadcast %cst_73 : f32 to vector<2x64xf32>
    %c0_74 = arith.constant 0 : index
    %c0_75 = arith.constant 0 : index
    %c0_76 = arith.constant 0 : index
    %77 = vector.load %arg10[%c0_74, %c0_75, %c0_76] : memref<3x2x4xf32, #tpu.memory_space<vmem>>, vector<1x2x4xf32>
    %78 = vector.shape_cast %77 : vector<1x2x4xf32> to vector<2x4xf32>
    %cst_77 = arith.constant dense<0.000000e+00> : vector<2x64xf32>
    %79 = tpu.matmul %78, %75, %cst_77 {dimension_numbers = #tpu.dot_dimension_numbers<[1], [0], [0], [1], [0, 0, 1, 1], [], []>} : vector<2x4xf32>, vector<4x64xf32>, vector<2x64xf32> -> vector<2x64xf32>
    %c0_78 = arith.constant 0 : index
    %c0_79 = arith.constant 0 : index
    %c0_80 = arith.constant 0 : index
    %80 = vector.load %arg11[%c0_78, %c0_79, %c0_80] : memref<3x64x64xf32, #tpu.memory_space<vmem>>, vector<1x64x64xf32>
    %81 = vector.shape_cast %80 : vector<1x64x64xf32> to vector<64x64xf32>
    %cst_81 = arith.constant dense<0.000000e+00> : vector<2x64xf32>
    %82 = tpu.matmul %79, %81, %cst_81 {dimension_numbers = #tpu.dot_dimension_numbers<[1], [0], [0], [1], [0, 0, 1, 1], [], []>} : vector<2x64xf32>, vector<64x64xf32>, vector<2x64xf32> -> vector<2x64xf32>
    %83 = arith.addf %76, %82 : vector<2x64xf32>
    %c1_82 = arith.constant 1 : index
    %c0_83 = arith.constant 0 : index
    %c0_84 = arith.constant 0 : index
    %84 = vector.load %arg10[%c1_82, %c0_83, %c0_84] : memref<3x2x4xf32, #tpu.memory_space<vmem>>, vector<1x2x4xf32>
    %85 = vector.shape_cast %84 : vector<1x2x4xf32> to vector<2x4xf32>
    %cst_85 = arith.constant dense<0.000000e+00> : vector<2x64xf32>
    %86 = tpu.matmul %85, %75, %cst_85 {dimension_numbers = #tpu.dot_dimension_numbers<[1], [0], [0], [1], [0, 0, 1, 1], [], []>} : vector<2x4xf32>, vector<4x64xf32>, vector<2x64xf32> -> vector<2x64xf32>
    %c1_86 = arith.constant 1 : index
    %c0_87 = arith.constant 0 : index
    %c0_88 = arith.constant 0 : index
    %87 = vector.load %arg11[%c1_86, %c0_87, %c0_88] : memref<3x64x64xf32, #tpu.memory_space<vmem>>, vector<1x64x64xf32>
    %88 = vector.shape_cast %87 : vector<1x64x64xf32> to vector<64x64xf32>
    %cst_89 = arith.constant dense<0.000000e+00> : vector<2x64xf32>
    %89 = tpu.matmul %86, %88, %cst_89 {dimension_numbers = #tpu.dot_dimension_numbers<[1], [0], [0], [1], [0, 0, 1, 1], [], []>} : vector<2x64xf32>, vector<64x64xf32>, vector<2x64xf32> -> vector<2x64xf32>
    %90 = arith.addf %83, %89 : vector<2x64xf32>
    %c2_90 = arith.constant 2 : index
    %c0_91 = arith.constant 0 : index
    %c0_92 = arith.constant 0 : index
    %91 = vector.load %arg10[%c2_90, %c0_91, %c0_92] : memref<3x2x4xf32, #tpu.memory_space<vmem>>, vector<1x2x4xf32>
    %92 = vector.shape_cast %91 : vector<1x2x4xf32> to vector<2x4xf32>
    %cst_93 = arith.constant dense<0.000000e+00> : vector<2x64xf32>
    %93 = tpu.matmul %92, %75, %cst_93 {dimension_numbers = #tpu.dot_dimension_numbers<[1], [0], [0], [1], [0, 0, 1, 1], [], []>} : vector<2x4xf32>, vector<4x64xf32>, vector<2x64xf32> -> vector<2x64xf32>
    %c2_94 = arith.constant 2 : index
    %c0_95 = arith.constant 0 : index
    %c0_96 = arith.constant 0 : index
    %94 = vector.load %arg11[%c2_94, %c0_95, %c0_96] : memref<3x64x64xf32, #tpu.memory_space<vmem>>, vector<1x64x64xf32>
    %95 = vector.shape_cast %94 : vector<1x64x64xf32> to vector<64x64xf32>
    %cst_97 = arith.constant dense<0.000000e+00> : vector<2x64xf32>
    %96 = tpu.matmul %93, %95, %cst_97 {dimension_numbers = #tpu.dot_dimension_numbers<[1], [0], [0], [1], [0, 0, 1, 1], [], []>} : vector<2x64xf32>, vector<64x64xf32>, vector<2x64xf32> -> vector<2x64xf32>
    %97 = arith.addf %90, %96 : vector<2x64xf32>
    %c0_98 = arith.constant 0 : index
    %c0_99 = arith.constant 0 : index
    %98 = vector.load %arg12[%c0_98, %c0_99] : memref<1x64xf32, #tpu.memory_space<vmem>>, vector<1x64xf32>
    %99 = vector.broadcast %98 : vector<1x64xf32> to vector<2x64xf32>
    %100 = arith.addf %97, %99 : vector<2x64xf32>
    %cst_100 = arith.constant 0.000000e+00 : f32
    %101 = vector.broadcast %cst_100 : f32 to vector<2x64xf32>
    %102 = arith.maximumf %100, %101 : vector<2x64xf32>
    %c0_101 = arith.constant 0 : index
    %c0_102 = arith.constant 0 : index
    %103 = vector.load %arg13[%c0_101, %c0_102] : memref<1x64xf32, #tpu.memory_space<vmem>>, vector<1x64xf32>
    %104 = vector.broadcast %103 : vector<1x64xf32> to vector<2x64xf32>
    %105 = arith.addf %102, %104 : vector<2x64xf32>
    %cst_103 = arith.constant 0.000000e+00 : f32
    %106 = vector.broadcast %cst_103 : f32 to vector<1x64xf32>
    %c0_104 = arith.constant 0 : index
    %c0_105 = arith.constant 0 : index
    %c0_106 = arith.constant 0 : index
    %107 = vector.load %arg14[%c0_104, %c0_105, %c0_106] : memref<3x1x2xf32, #tpu.memory_space<vmem>>, vector<1x1x2xf32>
    %108 = vector.shape_cast %107 : vector<1x1x2xf32> to vector<1x2xf32>
    %cst_107 = arith.constant dense<0.000000e+00> : vector<1x64xf32>
    %109 = tpu.matmul %108, %105, %cst_107 {dimension_numbers = #tpu.dot_dimension_numbers<[1], [0], [0], [1], [0, 0, 1, 1], [], []>} : vector<1x2xf32>, vector<2x64xf32>, vector<1x64xf32> -> vector<1x64xf32>
    %c0_108 = arith.constant 0 : index
    %c0_109 = arith.constant 0 : index
    %c0_110 = arith.constant 0 : index
    %110 = vector.load %arg15[%c0_108, %c0_109, %c0_110] : memref<3x64x64xf32, #tpu.memory_space<vmem>>, vector<1x64x64xf32>
    %111 = vector.shape_cast %110 : vector<1x64x64xf32> to vector<64x64xf32>
    %cst_111 = arith.constant dense<0.000000e+00> : vector<1x64xf32>
    %112 = tpu.matmul %109, %111, %cst_111 {dimension_numbers = #tpu.dot_dimension_numbers<[1], [0], [0], [1], [0, 0, 1, 1], [], []>} : vector<1x64xf32>, vector<64x64xf32>, vector<1x64xf32> -> vector<1x64xf32>
    %113 = arith.addf %106, %112 : vector<1x64xf32>
    %c1_112 = arith.constant 1 : index
    %c0_113 = arith.constant 0 : index
    %c0_114 = arith.constant 0 : index
    %114 = vector.load %arg14[%c1_112, %c0_113, %c0_114] : memref<3x1x2xf32, #tpu.memory_space<vmem>>, vector<1x1x2xf32>
    %115 = vector.shape_cast %114 : vector<1x1x2xf32> to vector<1x2xf32>
    %cst_115 = arith.constant dense<0.000000e+00> : vector<1x64xf32>
    %116 = tpu.matmul %115, %105, %cst_115 {dimension_numbers = #tpu.dot_dimension_numbers<[1], [0], [0], [1], [0, 0, 1, 1], [], []>} : vector<1x2xf32>, vector<2x64xf32>, vector<1x64xf32> -> vector<1x64xf32>
    %c1_116 = arith.constant 1 : index
    %c0_117 = arith.constant 0 : index
    %c0_118 = arith.constant 0 : index
    %117 = vector.load %arg15[%c1_116, %c0_117, %c0_118] : memref<3x64x64xf32, #tpu.memory_space<vmem>>, vector<1x64x64xf32>
    %118 = vector.shape_cast %117 : vector<1x64x64xf32> to vector<64x64xf32>
    %cst_119 = arith.constant dense<0.000000e+00> : vector<1x64xf32>
    %119 = tpu.matmul %116, %118, %cst_119 {dimension_numbers = #tpu.dot_dimension_numbers<[1], [0], [0], [1], [0, 0, 1, 1], [], []>} : vector<1x64xf32>, vector<64x64xf32>, vector<1x64xf32> -> vector<1x64xf32>
    %120 = arith.addf %113, %119 : vector<1x64xf32>
    %c2_120 = arith.constant 2 : index
    %c0_121 = arith.constant 0 : index
    %c0_122 = arith.constant 0 : index
    %121 = vector.load %arg14[%c2_120, %c0_121, %c0_122] : memref<3x1x2xf32, #tpu.memory_space<vmem>>, vector<1x1x2xf32>
    %122 = vector.shape_cast %121 : vector<1x1x2xf32> to vector<1x2xf32>
    %cst_123 = arith.constant dense<0.000000e+00> : vector<1x64xf32>
    %123 = tpu.matmul %122, %105, %cst_123 {dimension_numbers = #tpu.dot_dimension_numbers<[1], [0], [0], [1], [0, 0, 1, 1], [], []>} : vector<1x2xf32>, vector<2x64xf32>, vector<1x64xf32> -> vector<1x64xf32>
    %c2_124 = arith.constant 2 : index
    %c0_125 = arith.constant 0 : index
    %c0_126 = arith.constant 0 : index
    %124 = vector.load %arg15[%c2_124, %c0_125, %c0_126] : memref<3x64x64xf32, #tpu.memory_space<vmem>>, vector<1x64x64xf32>
    %125 = vector.shape_cast %124 : vector<1x64x64xf32> to vector<64x64xf32>
    %cst_127 = arith.constant dense<0.000000e+00> : vector<1x64xf32>
    %126 = tpu.matmul %123, %125, %cst_127 {dimension_numbers = #tpu.dot_dimension_numbers<[1], [0], [0], [1], [0, 0, 1, 1], [], []>} : vector<1x64xf32>, vector<64x64xf32>, vector<1x64xf32> -> vector<1x64xf32>
    %127 = arith.addf %120, %126 : vector<1x64xf32>
    %c0_128 = arith.constant 0 : index
    %c0_129 = arith.constant 0 : index
    %128 = vector.load %arg16[%c0_128, %c0_129] : memref<1x64xf32, #tpu.memory_space<vmem>>, vector<1x64xf32>
    %129 = arith.addf %127, %128 : vector<1x64xf32>
    %cst_130 = arith.constant 0.000000e+00 : f32
    %130 = vector.broadcast %cst_130 : f32 to vector<1x64xf32>
    %131 = arith.maximumf %129, %130 : vector<1x64xf32>
    %c0_131 = arith.constant 0 : index
    %c0_132 = arith.constant 0 : index
    %132 = vector.load %arg17[%c0_131, %c0_132] : memref<1x64xf32, #tpu.memory_space<vmem>>, vector<1x64xf32>
    %133 = arith.addf %131, %132 : vector<1x64xf32>
    %cst_133 = arith.constant dense<0.000000e+00> : vector<64xf32>
    %134 = vector.multi_reduction <add>, %133, %cst_133 [0] : vector<1x64xf32> to vector<64xf32>
    %135 = vector.shape_cast %134 : vector<64xf32> to vector<1x64xf32>
    %c0_134 = arith.constant 0 : index
    %c0_135 = arith.constant 0 : index
    %136 = vector.load %arg18[%c0_134, %c0_135] : memref<64x128xf32, #tpu.memory_space<vmem>>, vector<64x128xf32>
    %cst_136 = arith.constant dense<0.000000e+00> : vector<1x128xf32>
    %137 = tpu.matmul %135, %136, %cst_136 {dimension_numbers = #tpu.dot_dimension_numbers<[1], [0], [0], [1], [0, 0, 1, 1], [], []>} : vector<1x64xf32>, vector<64x128xf32>, vector<1x128xf32> -> vector<1x128xf32>
    %c0_137 = arith.constant 0 : index
    %c0_138 = arith.constant 0 : index
    %138 = vector.load %arg19[%c0_137, %c0_138] : memref<1x128xf32, #tpu.memory_space<vmem>>, vector<1x128xf32>
    %139 = arith.addf %137, %138 : vector<1x128xf32>
    %c0_139 = arith.constant 0 : index
    %c0_140 = arith.constant 0 : index
    %c0_141 = arith.constant 0 : index
    %140 = vector.load %arg20[%c0_139, %c0_140, %c0_141] : memref<1x1x128xf32, #tpu.memory_space<vmem>>, vector<1x1x128xf32>
    %141 = vector.shape_cast %140 : vector<1x1x128xf32> to vector<1x128xf32>
    %142 = vector.shape_cast %139 : vector<1x128xf32> to vector<1x1x128xf32>
    tpu.vector_store %arg20[%c0_139, %c0_140, %c0_141], %142 {strides = array<i32>} : memref<1x1x128xf32, #tpu.memory_space<vmem>>, vector<1x1x128xf32>,
    return
  }
  func.func @transform_0(%arg0: i32) -> (i32, i32, i32) {
    %c0_i32 = arith.constant 0 : i32
    %c0_i32_0 = arith.constant 0 : i32
    %c0_i32_1 = arith.constant 0 : i32
    return %arg0, %c0_i32, %c0_i32_0 : i32, i32, i32
  }
  func.func @transform_1(%arg0: i32) -> (i32, i32, i32) {
    %c0_i32 = arith.constant 0 : i32
    %c0_i32_0 = arith.constant 0 : i32
    %c0_i32_1 = arith.constant 0 : i32
    %c0_i32_2 = arith.constant 0 : i32
    return %c0_i32, %c0_i32_0, %c0_i32_1 : i32, i32, i32
  }
  func.func @transform_2(%arg0: i32) -> (i32, i32, i32) {
    %c0_i32 = arith.constant 0 : i32
    %c0_i32_0 = arith.constant 0 : i32
    %c0_i32_1 = arith.constant 0 : i32
    %c0_i32_2 = arith.constant 0 : i32
    return %c0_i32, %c0_i32_0, %c0_i32_1 : i32, i32, i32
  }
  func.func @transform_3(%arg0: i32) -> (i32, i32) {
    %c0_i32 = arith.constant 0 : i32
    %c0_i32_0 = arith.constant 0 : i32
    %c0_i32_1 = arith.constant 0 : i32
    return %c0_i32, %c0_i32_0 : i32, i32
  }
  func.func @transform_4(%arg0: i32) -> (i32, i32) {
    %c0_i32 = arith.constant 0 : i32
    %c0_i32_0 = arith.constant 0 : i32
    %c0_i32_1 = arith.constant 0 : i32
    return %c0_i32, %c0_i32_0 : i32, i32
  }
  func.func @transform_5(%arg0: i32) -> (i32, i32, i32) {
    %c0_i32 = arith.constant 0 : i32
    %c0_i32_0 = arith.constant 0 : i32
    %c0_i32_1 = arith.constant 0 : i32
    %c0_i32_2 = arith.constant 0 : i32
    return %c0_i32, %c0_i32_0, %c0_i32_1 : i32, i32, i32
  }
  func.func @transform_6(%arg0: i32) -> (i32, i32, i32) {
    %c0_i32 = arith.constant 0 : i32
    %c0_i32_0 = arith.constant 0 : i32
    %c0_i32_1 = arith.constant 0 : i32
    %c0_i32_2 = arith.constant 0 : i32
    return %c0_i32, %c0_i32_0, %c0_i32_1 : i32, i32, i32
  }
  func.func @transform_7(%arg0: i32) -> (i32, i32) {
    %c0_i32 = arith.constant 0 : i32
    %c0_i32_0 = arith.constant 0 : i32
    %c0_i32_1 = arith.constant 0 : i32
    return %c0_i32, %c0_i32_0 : i32, i32
  }
  func.func @transform_8(%arg0: i32) -> (i32, i32) {
    %c0_i32 = arith.constant 0 : i32
    %c0_i32_0 = arith.constant 0 : i32
    %c0_i32_1 = arith.constant 0 : i32
    return %c0_i32, %c0_i32_0 : i32, i32
  }
  func.func @transform_9(%arg0: i32) -> (i32, i32, i32) {
    %c0_i32 = arith.constant 0 : i32
    %c0_i32_0 = arith.constant 0 : i32
    %c0_i32_1 = arith.constant 0 : i32
    %c0_i32_2 = arith.constant 0 : i32
    return %c0_i32, %c0_i32_0, %c0_i32_1 : i32, i32, i32
  }
  func.func @transform_10(%arg0: i32) -> (i32, i32, i32) {
    %c0_i32 = arith.constant 0 : i32
    %c0_i32_0 = arith.constant 0 : i32
    %c0_i32_1 = arith.constant 0 : i32
    %c0_i32_2 = arith.constant 0 : i32
    return %c0_i32, %c0_i32_0, %c0_i32_1 : i32, i32, i32
  }
  func.func @transform_11(%arg0: i32) -> (i32, i32) {
    %c0_i32 = arith.constant 0 : i32
    %c0_i32_0 = arith.constant 0 : i32
    %c0_i32_1 = arith.constant 0 : i32
    return %c0_i32, %c0_i32_0 : i32, i32
  }
  func.func @transform_12(%arg0: i32) -> (i32, i32) {
    %c0_i32 = arith.constant 0 : i32
    %c0_i32_0 = arith.constant 0 : i32
    %c0_i32_1 = arith.constant 0 : i32
    return %c0_i32, %c0_i32_0 : i32, i32
  }
  func.func @transform_13(%arg0: i32) -> (i32, i32, i32) {
    %c0_i32 = arith.constant 0 : i32
    %c0_i32_0 = arith.constant 0 : i32
    %c0_i32_1 = arith.constant 0 : i32
    %c0_i32_2 = arith.constant 0 : i32
    return %c0_i32, %c0_i32_0, %c0_i32_1 : i32, i32, i32
  }
  func.func @transform_14(%arg0: i32) -> (i32, i32, i32) {
    %c0_i32 = arith.constant 0 : i32
    %c0_i32_0 = arith.constant 0 : i32
    %c0_i32_1 = arith.constant 0 : i32
    %c0_i32_2 = arith.constant 0 : i32
    return %c0_i32, %c0_i32_0, %c0_i32_1 : i32, i32, i32
  }
  func.func @transform_15(%arg0: i32) -> (i32, i32) {
    %c0_i32 = arith.constant 0 : i32
    %c0_i32_0 = arith.constant 0 : i32
    %c0_i32_1 = arith.constant 0 : i32
    return %c0_i32, %c0_i32_0 : i32, i32
  }
  func.func @transform_16(%arg0: i32) -> (i32, i32) {
    %c0_i32 = arith.constant 0 : i32
    %c0_i32_0 = arith.constant 0 : i32
    %c0_i32_1 = arith.constant 0 : i32
    return %c0_i32, %c0_i32_0 : i32, i32
  }
  func.func @transform_17(%arg0: i32) -> (i32, i32) {
    %c0_i32 = arith.constant 0 : i32
    %c0_i32_0 = arith.constant 0 : i32
    %c0_i32_1 = arith.constant 0 : i32
    return %c0_i32, %c0_i32_0 : i32, i32
  }
  func.func @transform_18(%arg0: i32) -> (i32, i32) {
    %c0_i32 = arith.constant 0 : i32
    %c0_i32_0 = arith.constant 0 : i32
    %c0_i32_1 = arith.constant 0 : i32
    return %c0_i32, %c0_i32_0 : i32, i32
  }
  func.func @transform_19(%arg0: i32) -> (i32, i32, i32) {
    %c0_i32 = arith.constant 0 : i32
    %c0_i32_0 = arith.constant 0 : i32
    %c0_i32_1 = arith.constant 0 : i32
    return %arg0, %c0_i32, %c0_i32_0 : i32, i32, i32
  }
}

</mosaic_0001>

<bundles_post_ra>
// kernel: cnn_model_forward.1
= control target key start
LH: loop header
LB: loop body
LE: loop exit
PB: predicated region body
PF: predicated region fallthrough
CT: control target
= control target key end

     0   :  { %s2708_s0 = inlined_call_operand.hbm [shape: f32[2,16,16], index: 0, kind: input, shape index: {}]   ;;  %s2709_s1 = inlined_call_operand.hbm [shape: f32[5,8,16], index: 1, kind: input, shape index: {}]   ;;  %s2710_s2 = inlined_call_operand.hbm [shape: f32[5,16,64], index: 2, kind: input, shape index: {}]   ;;  %s2711_s3 = inlined_call_operand.vmem [shape: f32[1,64], index: 3, kind: input, shape index: {}]   ;;  %s2712_s4 = inlined_call_operand.vmem [shape: f32[1,64], index: 4, kind: input, shape index: {}]   ;;  %s2713_s5 = inlined_call_operand.hbm [shape: f32[3,4,8], index: 5, kind: input, shape index: {}]   ;;  %s2714_s6 = inlined_call_operand.hbm [shape: f32[3,64,64], index: 6, kind: input, shape index: {}]   ;;  %s2715_s7 = inlined_call_operand.vmem [shape: f32[1,64], index: 7, kind: input, shape index: {}]   ;;  %s2716_s8 = inlined_call_operand.vmem [shape: f32[1,64], index: 8, kind: input, shape index: {}]   ;;  %s2717_s9 = inlined_call_operand.vmem [shape: f32[3,2,4], index: 9, kind: input, shape index: {}]   ;;  %s2718_s10 = inlined_call_operand.hbm [shape: f32[3,64,64], index: 10, kind: input, shape index: {}]   ;;  %s2719_s11 = inlined_call_operand.vmem [shape: f32[1,64], index: 11, kind: input, shape index: {}]   ;;  %s2720_s12 = inlined_call_operand.vmem [shape: f32[1,64], index: 12, kind: input, shape index: {}]   ;;  %s2721_s13 = inlined_call_operand.vmem [shape: f32[3,1,2], index: 13, kind: input, shape index: {}]   ;;  %s2722_s14 = inlined_call_operand.hbm [shape: f32[3,64,64], index: 14, kind: input, shape index: {}]   ;;  %s2723_s15 = inlined_call_operand.vmem [shape: f32[1,64], index: 15, kind: input, shape index: {}]   ;;  %s2724_s16 = inlined_call_operand.vmem [shape: f32[1,64], index: 16, kind: input, shape index: {}]   ;;  %s2725_s17 = inlined_call_operand.hbm [shape: f32[64,128], index: 17, kind: input, shape index: {}]   ;;  %s2726_s18 = inlined_call_operand.hbm [shape: f32[1,128], index: 18, kind: input, shape index: {}]   ;;  %s2727_s19 = inlined_call_operand.hbm [shape: f32[2,1,128], index: 19, kind: output, shape index: {}]  }
   0x1   :  { %2734 = sst [smem:[#allocation24_spill]] %s2708_s0 }
   0x2   :  { %2735 = sst [smem:[#allocation25_spill]] %s2709_s1 }
   0x3   :  { %2736 = sst [smem:[#allocation26_spill]] %s2710_s2 }
   0x4   :  { %2737 = sst [smem:[#allocation27_spill]] %s2711_s3 }
   0x5   :  { %2738 = sst [smem:[#allocation28_spill]] %s2713_s5 }
   0x6   :  { %2739 = sst [smem:[#allocation29_spill]] %s2714_s6 }
   0x7   :  { %2740 = sst [smem:[#allocation30_spill]] %s2717_s9 }
   0x8   :  { %2741 = sst [smem:[#allocation31_spill]] %s2718_s10 }
   0x9   :  { %2742 = sst [smem:[#allocation32_spill]] %s2719_s11 }
   0xa   :  { %2743 = sst [smem:[#allocation33_spill]] %s2720_s12 }
   0xb   :  { %2744 = sst [smem:[#allocation34_spill]] %s2721_s13 }
   0xc   :  { %2745 = sst [smem:[#allocation35_spill]] %s2722_s14 }
   0xd   :  { %2746 = sst [smem:[#allocation36_spill]] %s2723_s15 }
   0xe   :  { %2747 = sst [smem:[#allocation37_spill]] %s2724_s16 }
   0xf   :  { %2748 = sst [smem:[#allocation38_spill]] %s2727_s19 }
  0x10   :  { %24 = vsyncpa [#allocation3], 0 }
  0x11   :  { %26 = vsyncpa [#allocation3 + $0x1], 0 }
  0x12   :  { %27 = vsyncpa [#allocation6], 0 }
  0x13   :  { %28 = vsyncpa [#allocation9], 0 }
  0x14   :  { %29 = vsyncpa [#allocation12], 0 }
  0x15   :  { %30 = vsyncpa [#allocation15], 0 }
  0x16   :  { %31 = vsyncpa [#allocation4], 0 }
  0x17   :  { %33 = vsyncpa [#allocation4 + $0x1], 0  ;;  %s2429_s0 = smov 0   ;;  %s2431_s30 = smov 0  }
  0x18   :  { %s2433_s20 = smov 0   ;;  %s2435_s21 = smov 0  }
  0x19 LB: > { %s2749_s2 = sld [smem:[#allocation25_spill]]  ;;  %s2453_s24 = sadd.s32 4294967295, %s2315_s21   ;;  %s2315_s21 = sphi %s2435_s21, %s2777_s21   ;;  %s2311_s20 = sphi %s2433_s20, %s2776_s20   ;;  %s2307_s30 = sphi %s2431_s30, %s2775_s30   ;;  %s2303_s0 = sphi %s2429_s0, %s2774_s0  }
  0x1a   : > { %p1761_p0 = scmp.ge.s32.totalorder %s2315_s21, 1  ;;  %p60_p1 = scmp.eq.s32.totalorder %s2453_s24, 0 }
  0x1b   : > { %p474_p2 = scmp.lt.s32.totalorder %s2315_s21, 3  ;;  %s2317_s3 = smov [#allocation5]  }
  0x1c   : > { %s487_s26 = sshll.u32 %s2317_s3, 4  ;;  %s2751_s5 = sld [smem:[#allocation28_spill]]  ;;  %s488_s26 = int_to_ptr.vmem [resolvable:$true] %s487_s26 }
  0x1d   : > { %p2458_p3 = pnand %p1761_p0, %p474_p2  ;;  %s2318_s22 = smov [#allocation8]  }
  0x1e   : > { %s2732_s3 = smov 128   ;;  %s2733_s19 = smov 8  }
  0x1f   : > { %s485_s23 = sshll.u32 %s2749_s2, 4  ;;  %p1862_p4 = pneg %p2458_p3  ;;  %s486_s23 = int_to_ptr.hbm [resolvable:$true] %s485_s23 }
  0x20   : > { %s521_s2 = sshll.u32 %s2318_s22, 4  ;;  %s2321_s27 = smov 64   ;;  %s522_s2 = int_to_ptr.vmem [resolvable:$true] %s521_s2 }
  0x21   : > { %p2470_p6 = pnand %p1862_p4, %p60_p1  ;;  %s2322_s28 = smov 4  }
  0x22   : > { %s519_s29 = sshll.u32 %s2751_s5, 4  ;;  %s2753_s10 = sld [smem:[#allocation31_spill]]  ;;  %s520_s29 = int_to_ptr.hbm [resolvable:$true] %s519_s29 }
  0x23   : > { %1865 = dma.hbm_to_vmem [thread:$0]  (!%p2470_p6), %s486_s23, 640, %s488_s26, [#allocation6], %s2732_s3, %s2732_s3, %s2733_s19  }
  0x24   : > { %1871 = dma.hbm_to_vmem [thread:$0]  (!%p2470_p6), %s520_s29, 192, %s522_s2, [#allocation9], %s2321_s27, %s2321_s27, %s2322_s28  }
  0x25   : > { %s2323_s13 = smov [#allocation11]   ;;  %s599_s9 = sshll.u32 %s2725_s17, 4  ;;  %s600_s9 = int_to_ptr.hbm [resolvable:$true] %s599_s9 }
  0x26   : > { %s558_s22 = sshll.u32 %s2323_s13, 4  ;;  %s2324_s23 = smov [#allocation14]   ;;  %s559_s22 = int_to_ptr.vmem [resolvable:$true] %s558_s22 }
  0x27   : > { %s601_s26 = sshll.u32 %s2324_s23, 4  ;;  %s2754_s16 = sld [smem:[#allocation26_spill]]  ;;  %s602_s26 = int_to_ptr.vmem [resolvable:$true] %s601_s26 }
  0x28   : > { %s556_s15 = sshll.u32 %s2753_s10, 4  ;;  %s2755_s6 = sld [smem:[#allocation29_spill]]  ;;  %s557_s15 = int_to_ptr.hbm [resolvable:$true] %s556_s15 }
  0x29   : > { %1877 = dma.hbm_to_vmem [thread:$0]  (!%p2470_p6), %s557_s15, 3072, %s559_s22, [#allocation12], %s2732_s3, %s2732_s3, %s2733_s19  }
  0x2a   : > { %1883 = dma.hbm_to_vmem [thread:$0]  (!%p2470_p6), %s600_s9, 1024, %s602_s26, [#allocation15], %s2732_s3, %s2732_s3, %s2733_s19  }
  0x2b   : > { %s2325_s15 = smov [#allocation7]   ;;  %s2326_s28 = smov [#allocation10]  }
  0x2c   : > { %s501_s27 = sshll.u32 %s2325_s15, 4  ;;  %s535_s22 = sshll.u32 %s2326_s28, 4  ;;  %s502_s27 = int_to_ptr.vmem [resolvable:$true] %s501_s27  ;;  %s536_s22 = int_to_ptr.vmem [resolvable:$true] %s535_s22 }
  0x2d   : > { %s499_s2 = sshll.u32 %s2754_s16, 4  ;;  %s2756_s14 = sld [smem:[#allocation35_spill]]  ;;  %s500_s2 = int_to_ptr.hbm [resolvable:$true] %s499_s2 }
  0x2e   : > { %s533_s13 = sshll.u32 %s2755_s6, 4  ;;  %s614_s16 = sshll.u32 %s2726_s18, 4  ;;  %s534_s13 = int_to_ptr.hbm [resolvable:$true] %s533_s13  ;;  %s615_s16 = int_to_ptr.hbm [resolvable:$true] %s614_s16 }
  0x2f   : > { %1868 = dma.hbm_to_vmem [thread:$0]  (!%p2470_p6), %s500_s2, 1280, %s502_s27, [#allocation6], %s2732_s3, %s2732_s3, %s2733_s19  }
  0x30   : > { %1874 = dma.hbm_to_vmem [thread:$0]  (!%p2470_p6), %s534_s13, 3072, %s536_s22, [#allocation9], %s2732_s3, %s2732_s3, %s2733_s19  }
  0x31   : > { %s2327_s2 = smov [#allocation13]   ;;  %s2328_s12 = smov [#allocation16]  }
  0x32   : > { %s581_s11 = sshll.u32 %s2327_s2, 4  ;;  %s616_s13 = sshll.u32 %s2328_s12, 4  ;;  %s582_s11 = int_to_ptr.vmem [resolvable:$true] %s581_s11  ;;  %s617_s13 = int_to_ptr.vmem [resolvable:$true] %s616_s13 }
  0x33   : > { %s579_s26 = sshll.u32 %s2756_s14, 4  ;;  %s1760_s15 = sadd.s32 4294967294, %s2315_s21   ;;  %s580_s26 = int_to_ptr.hbm [resolvable:$true] %s579_s26 }
  0x34   : > { %1880 = dma.hbm_to_vmem [thread:$0]  (!%p2470_p6), %s580_s26, 3072, %s582_s11, [#allocation12], %s2732_s3, %s2732_s3, %s2733_s19  }
  0x35   : > { %1886 = dma.hbm_to_vmem [thread:$0]  (!%p2470_p6), %s615_s16, 16, %s617_s13, [#allocation15]  }
  0x36   : > { %s2528_s27 = sadd.s32 1, %s2315_s21   ;;  %s46_s22 = sadd.s32 1, %s2311_s20 }
  0x37   : > { %s43_s28 = ssub.s32 %s2315_s21, %s2528_s27  ;;  %p53_p8 = scmp.ne.s32.totalorder %s2311_s20, %s2307_s30 }
  0x38   : > { %p44_p7 = scmp.eq.s32.totalorder %s43_s28, 0  ;;  %p54_p9 = scmp.eq.s32.totalorder %s2315_s21, 0 }
  0x39   : > { %p59_p10 = scmp.ne.s32.totalorder %s2307_s30, %s2303_s0  ;;  %p461_p13 = scmp.eq.s32.totalorder %s2453_s24, 1 }
  0x3a   : > { %s2539_s23 = scalar_select %p44_p7, %s2311_s20, %s46_s22  }
  0x3b   : > { %p2541_p11 = por %p54_p9, %p53_p8  ;;  %p2547_p12 = por %p60_p1, %p59_p10 }
  0x3c   : > { %p467_p0 = scmp.eq.s32.totalorder %s1760_s15, 1  ;;  %p1903_p2 = scmp.lt.s32.totalorder %s2315_s21, 2 }
  0x3d   : > { %s627_s26 = sand.u32 1, %s2311_s20   ;;  %p2554_p4 = por %p461_p13, %p53_p8 }
  0x3e   : > { %p2558_p6 = por %p467_p0, %p59_p10  ;;  %s1771_s16 = sshll.u32 %s627_s26, 4 }
  0x3f   : > { %s1825_s2 = sshll.u32 %s2315_s21, 4  ;;  %s2761_s13 = sld [smem:[#allocation24_spill]] }
  0x40   : > { %s631_s22 = scalar_lea.vmem [#allocation2], %s1771_s16  ;;  %p2568_p7 = pnand %p1903_p2, %p2541_p11 }
  0x41   : > { %s639_s3 = sshll.u32 %s631_s22, 4  ;;  %s628_s6 = scalar_lea.sflag [#allocation3], %s627_s26  ;;  %s640_s3 = int_to_ptr.vmem [resolvable:$true] %s639_s3 }
  0x42   : > { %p2207_p9 = pneg %p2568_p7 }
  0x45   : > { %s636_s28 = scalar_lea.hbm %s2761_s13, %s1825_s2  ;;  %s2210_s11 = scalar_lea.hbm %s2761_s13, 32 }
  0x46   : > { %s637_s19 = sshll.u32 %s636_s28, 4  ;;  %s638_s19 = int_to_ptr.hbm [resolvable:$true] %s637_s19 }
  0x47   : > { %s2203_s10 = sshra.s32 %s638_s19, 4  ;;  %s2204_s10 = int_to_ptr.hbm [resolvable:$true] %s2203_s10 }
  0x48   : > { %s2205_s14 = scalar_lea.hbm %s2204_s10, 16  ;;  %p2211_p11 = scmp.lt.s32.totalorder %s2204_s10, %s2761_s13 }
  0x49   : > { %p2206_p8 = scmp.ne.s32.totalorder %s2204_s10, %s2205_s14  ;;  %p2212_p0 = scmp.lt.s32.totalorder %s2210_s11, %s2205_s14 }
  0x4b   : > { %p2208_p10 = pnand %p2207_p9, %p2206_p8  ;;  %p2213_p2 = por %p2212_p0, %p2211_p11 }
  0x4d   : > { %p2209_p13 = pneg %p2208_p10 }
  0x4f   : > { %p2214_p5 = pnand %p2213_p2, %p2209_p13 }
  0x51   : > { %2217 = shalt.err (!%p2214_p5)
}
  0x52   : > { %s2763_s26 = smov 8   ;;  %s2764_s28 = smov 128  }
  0x53   : > { %1890 = dma.hbm_to_vmem [thread:$0]  (!%p2568_p7), %s638_s19, 256, %s640_s3, %s628_s6, %s2764_s28, %s2764_s28, %s2763_s26  }
  0x54   : > { %651 = sbr.rel (%p2458_p3) target bundleno = 1472 (0x5c0), region = 96  ;;  %s2588_s22 = sand.u32 (!%p2458_p3), 1, %s2307_s30  }
  0x55   : > { %s1775_s10 = sshll.u32 (!%p2458_p3), %s2588_s22, 4  ;;  %s654_s14 = scalar_lea.sflag (!%p2458_p3), [#allocation3], %s2588_s22 }
  0x56   : > { %s657_s16 = scalar_lea.vmem (!%p2458_p3), [#allocation2], %s1775_s10 }
  0x59   : > { %2278 = dma.done.wait (%p2547_p12), %s654_s14, 256  }
  0x5a   : > { %2280 = vsyncadd (%p2547_p12), %s654_s14, 4294967040 }
  0x5b   : > { %2282 = dma.done.wait (%p60_p1), [#allocation6], 1920  }
  0x5c   : > { %2284 = vsyncadd (%p60_p1), [#allocation6], 4294965376 }
  0x5d   : > { %2286 = dma.done.wait (%p60_p1), [#allocation9], 3264  }
  0x5e   : > { %2288 = vsyncadd (%p60_p1), [#allocation9], 4294964032 }
  0x5f   : > { %2290 = dma.done.wait (%p60_p1), [#allocation12], 6144  }
  0x60   : > { %2292 = vsyncadd (%p60_p1), [#allocation12], 4294961152 }
  0x61   : > { %2294 = dma.done.wait (%p60_p1), [#allocation15], 1040  }
  0x62   : > { %2296 = vsyncadd (%p60_p1), [#allocation15], 4294966256  ;;  %v753_v0 = vld [vmem:[%s657_s16 + $0x8] sm:$0xff]  ;;  %v752_v1 = vld [vmem:[%s657_s16] sm:$0xff]  ;;  %vm755_vm0 = vcmask 130048   ;;  %s2765_s25 = sld [smem:[#allocation27_spill]] }
  0x63   : > { %v754_v2 = vld [vmem:[#allocation5] sm:$0xff]  ;;  %773 = vmatpush.msra.mxu2 %v753_v0  ;;  %800 = vmatpush.msra.mxu1 %v753_v0  ;;  %v782_v3 = vld [vmem:[#allocation5 + $0x8] sm:$0xff]  ;;  %v856_v4 = vld [vmem:[#allocation5 + $0x10] sm:$0xff]  ;;  %vm1023_vm1 = vcmask 64512   ;;  %vm1089_vm2 = vcmask 523264   ;;  %vm1210_vm3 = vcmask 1043456  }
  0x64   : > { %v808_v5 = vld [vmem:[#allocation7 + $0x18] sm:$0xff]  ;;  %874 = vmatpush.msra.mxu0 %v753_v0  ;;  %v807_v6 = vld [vmem:[#allocation7 + $0x10] sm:$0xff]  ;;  %v780_v7 = vld [vmem:[#allocation7 + $0x8] sm:$0xff]  ;;  %s2766_s28 = sld [smem:[#allocation30_spill]]  ;;  %vm1206_vm4 = vcmask 31744   ;;  %vm1396_vm5 = vcmask 1041408  }
  0x65   : > { %774 = vmatpush.msra.mxu2 %v752_v1  ;;  %801 = vmatpush.msra.mxu1 %v752_v1  ;;  %v779_v8 = vld [vmem:[#allocation7] sm:$0xff]  ;;  %v882_v9 = vld [vmem:[#allocation7 + $0x28] sm:$0xff]  ;;  %v960_v11 = vld [vmem:[#allocation5 + $0x20] sm:$0xff]  ;;  %s2767_s3 = sld [smem:[#allocation32_spill]]  ;;  %vm1392_vm6 = vcmask 15360   ;;  %s751_s10 = scalar_lea.vmem [#allocation17], %s2588_s22 }
  0x66   : > { %1784 = vmatmul.msk.f32.vlgmr.msra.gmra.mxu2 %vm755_vm0, %v754_v2  ;;  %1785 = vmatmul.msk.f32.vlgmr.msra.gmra.mxu1 %vm755_vm0, %v782_v3  ;;  %v881_v10 = vld [vmem:[#allocation7 + $0x20] sm:$0xff]  ;;  %v908_v15 = vld [vmem:[#allocation5 + $0x18] sm:$0xff]  ;;  %v934_v16 = vld [vmem:[#allocation7 + $0x38] sm:$0xff]  ;;  %s2768_s2 = sld [smem:[#allocation33_spill]]  ;;  %s1616_s14 = sshll.u32 %s751_s10, 4  ;;  %s1617_s14 = int_to_ptr.vmem [resolvable:$true] %s1616_s14 }
  0x67   : > { %875 = vmatpush.msra.mxu0 %v752_v1  ;;  %826 = vmatpush.msrb.mxu2 %v808_v5  ;;  %v933_v17 = vld [vmem:[#allocation7 + $0x30] sm:$0xff]  ;;  %v986_v18 = vld [vmem:[#allocation7 + $0x48] sm:$0xff]  ;;  %v985_v19 = vld [vmem:[#allocation7 + $0x40] sm:$0xff]  ;;  %s2769_s9 = sld [smem:[#allocation34_spill]]  ;;  %s1606_s6 = scalar_lea.sflag [#allocation4], %s2588_s22 }
  0x68   : > { %1788 = vmatmul.msk.f32.vlgmr.msra.gmra.mxu0 %vm755_vm0, %v856_v4  ;;  %849 = vmatpush.msra.mxu3 %v780_v7  ;;  %v1088_v23 = vld [vmem:[#allocation10 + $0x78] sm:$0xff]  ;;  %v1087_v25 = vld [vmem:[#allocation10 + $0x70] sm:$0xff]  ;;  %v1086_v27 = vld [vmem:[#allocation10 + $0x68] sm:$0xff]  ;;  %s2771_s15 = sld [smem:[#allocation37_spill]] }
  0x69   : > { %978 = vmatpush.msrb.mxu0 %v753_v0  ;;  %827 = vmatpush.msrb.mxu2 %v807_v6  ;;  %v1054_v24 = vld [vmem:[#allocation10 + $0x38] sm:$0xff]  ;;  %v1053_v26 = vld [vmem:[#allocation10 + $0x30] sm:$0xff]  ;;  %v1052_v28 = vld [vmem:[#allocation10 + $0x28] sm:$0xff]  ;;  %s2772_s12 = sld [smem:[#allocation38_spill]] }
  0x6a   : > { %850 = vmatpush.msra.mxu3 %v779_v8  ;;  %900 = vmatpush.msrb.mxu1 %v882_v9  ;;  %v1085_v31 = vld [vmem:[#allocation10 + $0x60] sm:$0xff]  ;;  %v1084_v33 = vld [vmem:[#allocation10 + $0x58] sm:$0xff]  ;;  %v1083_v36 = vld [vmem:[#allocation10 + $0x50] sm:$0xff] }
  0x6b   : > { %979 = vmatpush.msrb.mxu0 %v752_v1  ;;  %926 = vmatpush.msra.mxu2 %v753_v0  ;;  %v1051_v32 = vld [vmem:[#allocation10 + $0x20] sm:$0xff]  ;;  %v1050_v34 = vld [vmem:[#allocation10 + $0x18] sm:$0xff]  ;;  %v1049_v37 = vld [vmem:[#allocation10 + $0x10] sm:$0xff] }
  0x6c   : > { %901 = vmatpush.msrb.mxu1 %v881_v10  ;;  %952 = vmatpush.msrb.mxu3 %v934_v16  ;;  %v1082_v38 = vld [vmem:[#allocation10 + $0x48] sm:$0xff]  ;;  %v1957_v44 = vld [vmem:[%s2765_s25] ss:$0 sm:$0xff]  ;;  %v1022_v50 = vld [vmem:[#allocation8] sm:$0xf]  ;;  %s2770_s25 = sld [smem:[#allocation36_spill]] }
  0x6d   : > { %927 = vmatpush.msra.mxu2 %v752_v1  ;;  %1101 = vmatpush.msra.mxu0 %v1088_v23  ;;  %v1048_v39 = vld [vmem:[#allocation10 + $0x8] sm:$0xff]  ;;  %v1958_v47 = vld [vmem:[%s2712_s4] ss:$0 sm:$0xff]  ;;  %v1056_v51 = vld [vmem:[#allocation8 + $0x4] sm:$0xf] }
  0x6e   : > { %953 = vmatpush.msrb.mxu3 %v933_v17  ;;  %1004 = vmatpush.msra.mxu1 %v986_v18  ;;  %v1169_v52 = vld [vmem:[#allocation10 + $0xb8] sm:$0xff]  ;;  %v1168_v53 = vld [vmem:[#allocation10 + $0xb0] sm:$0xff]  ;;  %v1167_v54 = vld [vmem:[#allocation10 + $0xa8] sm:$0xff] }
  0x6f   : > { %1102 = vmatpush.msra.mxu0 %v1087_v25  ;;  %v1137_v55 = vld [vmem:[#allocation8 + $0x8] sm:$0xf]  ;;  %v1081_v56 = vld [vmem:[#allocation10 + $0x40] sm:$0xff]  ;;  %v1164_v60 = vld [vmem:[#allocation10 + $0x90] sm:$0xff]  ;;  %s1614_s26 = scalar_lea.hbm %s2772_s12, %s2453_s24  ;;  %s2253_s24 = scalar_lea.hbm %s2772_s12, 2 }
  0x70   : > { %1792 = vmatmul.msk.f32.vlgmr.msrb.gmra.mxu0 %vm755_vm0, %v960_v11  ;;  %1005 = vmatpush.msra.mxu1 %v985_v19  ;;  %v1047_v57 = vld [vmem:[#allocation10] sm:$0xff]  ;;  %v1165_v59 = vld [vmem:[#allocation10 + $0x98] sm:$0xff]  ;;  %v1163_v61 = vld [vmem:[#allocation10 + $0x88] sm:$0xff]  ;;  %s1618_s16 = sshll.u32 %s1614_s26, 4  ;;  %s1619_s16 = int_to_ptr.hbm [resolvable:$true] %s1618_s16 }
  0x71   : > { %1103 = vmatpush.msra.mxu0 %v1086_v27  ;;  %v1166_v58 = vld [vmem:[#allocation10 + $0xa0] sm:$0xff]  ;;  %v1275_v2 = vld [vmem:[#allocation11 + $0x78] sm:$0xff]  ;;  %v1274_v3 = vld [vmem:[#allocation11 + $0x70] sm:$0xff]  ;;  %s2247_s19 = sshra.s32 %s1619_s16, 4  ;;  %s2248_s19 = int_to_ptr.hbm [resolvable:$true] %s2247_s19 }
  0x72   : > { %v1162_v62 = vld [vmem:[#allocation10 + $0x80] sm:$0xff]  ;;  %v1273_v4 = vld [vmem:[#allocation11 + $0x68] sm:$0xff]  ;;  %v1959_v9 = vld [vmem:[%s2715_s7] ss:$0 sm:$0xff]  ;;  %p2254_p12 = scmp.lt.s32.totalorder %s2248_s19, %s2772_s12 }
  0x73   : > { %1104 = vmatpush.msra.mxu0 %v1085_v31  ;;  %v1272_v5 = vld [vmem:[#allocation11 + $0x60] sm:$0xff]  ;;  %v1205_v16 = vld [vmem:[%s2766_s28] sm:$0x3]  ;;  %v1802_v18 = vld [vmem:[%s2766_s28 + $0x2] sm:$0x3] }
  0x74   : > { %v1807_v17 = vld [vmem:[%s2766_s28 + $0x4] sm:$0x3]  ;;  %v1241_v19 = vld [vmem:[#allocation11 + $0x38] sm:$0xff]  ;;  %v1239_v23 = vld [vmem:[#allocation11 + $0x28] sm:$0xff] }
  0x75   : > { %1105 = vmatpush.msra.mxu0 %v1084_v33  ;;  %v1238_v25 = vld [vmem:[#allocation11 + $0x20] sm:$0xff]  ;;  %v1236_v27 = vld [vmem:[#allocation11 + $0x10] sm:$0xff]  ;;  %v1351_v33 = vld [vmem:[#allocation11 + $0x98] sm:$0xff] }
  0x76   : > { %v1352_v31 = vld [vmem:[#allocation11 + $0xa0] sm:$0xff] }
  0x77   : > { %1106 = vmatpush.msra.mxu0 %v1083_v36  ;;  %v1268_v36 = vld [vmem:[#allocation11 + $0x40] sm:$0xff] }
  0x79   : > { %1107 = vmatpush.msra.mxu0 %v1082_v38  ;;  %v1348_v38 = vld [vmem:[#allocation11 + $0x80] sm:$0xff] }
  0x7b   : > { %1108 = vmatpush.msra.mxu0 %v1081_v56  ;;  %v1962_v56 = vld [vmem:[%s2768_s2] ss:$0 sm:$0xff] }
  0xe3   : > { %v803_v12 = vpop.f32.mrf.mxu1 }
  0xe4   : > { %1786 = vmatmul.msk.f32.vlgmr.msrb.gmra.mxu2 %vm755_vm0, %v803_v12 }
  0xe5   : > { %v877_v13 = vpop.f32.mrf.mxu0 }
  0xe6   : > { %1789 = vmatmul.msk.f32.vlgmr.msrb.gmra.mxu1 %vm755_vm0, %v877_v13  ;;  %v1960_v13 = vld [vmem:[%s2716_s8] ss:$0 sm:$0xff] }
  0xe7   : > { %1124 = vmatpush.msrb.mxu1 %v1054_v24  ;;  %v1353_v24 = vld [vmem:[#allocation11 + $0xa8] sm:$0xff] }
  0xe9   : > { %v776_v14 = vpop.f32.mrf.mxu2  ;;  %1125 = vmatpush.msrb.mxu1 %v1053_v26  ;;  %v1237_v26 = vld [vmem:[#allocation11 + $0x18] sm:$0xff] }
  0xea   : > { %1787 = vmatmul.msk.f32.vlgmr.msra.gmra.mxu3 %vm755_vm0, %v776_v14 }
  0xeb   : > { %1126 = vmatpush.msrb.mxu1 %v1052_v28  ;;  %v1235_v28 = vld [vmem:[#allocation11 + $0x8] sm:$0xff] }
  0xec   : > { %1790 = vmatmul.msk.f32.vlgmr.msra.gmra.mxu2 %vm755_vm0, %v908_v15 }
  0xed   : > { %v981_v20 = vpop.f32.mrf.mxu0  ;;  %1127 = vmatpush.msrb.mxu1 %v1051_v32  ;;  %v1270_v32 = vld [vmem:[#allocation11 + $0x50] sm:$0xff] }
  0xee   : > { %1793 = vmatmul.msk.f32.vlgmr.msra.gmra.mxu1 %vm755_vm0, %v981_v20  ;;  %v1355_v20 = vld [vmem:[#allocation11 + $0xb8] sm:$0xff] }
  0xef   : > { %1128 = vmatpush.msrb.mxu1 %v1050_v34  ;;  %v1269_v34 = vld [vmem:[#allocation11 + $0x48] sm:$0xff] }
  0xf1   : > { %1129 = vmatpush.msrb.mxu1 %v1049_v37  ;;  %v1349_v37 = vld [vmem:[#allocation11 + $0x88] sm:$0xff] }
  0xf3   : > { %1130 = vmatpush.msrb.mxu1 %v1048_v39 }
  0xf5   : > { %1131 = vmatpush.msrb.mxu1 %v1047_v57 }
  0xf7   : > { %1287 = vmatpush.msra.mxu1 %v1275_v2  ;;  %v1425_v2 = vld [vmem:[#allocation13 + $0x28] sm:$0xff] }
  0xf9   : > { %1288 = vmatpush.msra.mxu1 %v1274_v3  ;;  %v1539_v3 = vld [vmem:[#allocation13 + $0xa8] sm:$0xff] }
  0xfb   : > { %1289 = vmatpush.msra.mxu1 %v1273_v4  ;;  %v1424_v4 = vld [vmem:[#allocation13 + $0x20] sm:$0xff] }
  0xfd   : > { %1290 = vmatpush.msra.mxu1 %v1272_v5  ;;  %v1423_v5 = vld [vmem:[#allocation13 + $0x18] sm:$0xff] }
 0x163   : > { %v903_v30 = vpop.f32.mrf.mxu1 }
 0x167   : > { %v829_v21 = vpop.f32.mrf.mxu2 }
 0x16b   : > { %v1007_v42 = vpop.f32.mrf.mxu1 }
 0x16d   : > { %v852_v29 = vpop.f32.mrf.mxu3 }
 0x16e   : > { %v853_v35 = vadd.f32 %v852_v29, %v829_v21  ;;  %v1240_v21 = vld [vmem:[#allocation11 + $0x30] sm:$0xff]  ;;  %v1271_v29 = vld [vmem:[#allocation11 + $0x58] sm:$0xff] }
 0x16f   : > { %v929_v22 = vpop.f32.mrf.mxu2  ;;  %1291 = vmatpush.msra.mxu1 %v1271_v29 }
 0x170   : > { %1791 = vmatmul.msk.f32.vlgmr.msrb.gmra.mxu3 %vm755_vm0, %v929_v22  ;;  %v906_v40 = vadd.f32 %v903_v30, %v853_v35  ;;  %v1354_v22 = vld [vmem:[#allocation11 + $0xb0] sm:$0xff]  ;;  %v1234_v30 = vld [vmem:[#allocation11] sm:$0xff] }
 0x171   : > { %1292 = vmatpush.msra.mxu1 %v1270_v32  ;;  %v1350_v35 = vld [vmem:[#allocation11 + $0x90] sm:$0xff] }
 0x173   : > { %1293 = vmatpush.msra.mxu1 %v1269_v34 }
 0x175   : > { %1294 = vmatpush.msra.mxu1 %v1268_v36  ;;  %v1580_v36 = vld [vmem:[#allocation16] sm:$0x1] }
 0x1f3   : > { %v955_v41 = vpop.f32.mrf.mxu3 }
 0x1f4   : > { %v958_v43 = vadd.f32 %v955_v41, %v906_v40 }
 0x1f6   : > { %v1010_v45 = vadd.f32 %v1007_v42, %v958_v43  ;;  %v1461_v42 = vld [vmem:[#allocation13 + $0x78] sm:$0xff]  ;;  %v1460_v43 = vld [vmem:[#allocation13 + $0x70] sm:$0xff] }
 0x1f8   : > { %v1015_v46 = vadd.f32 %v1957_v44, %v1010_v45  ;;  %v1459_v44 = vld [vmem:[#allocation13 + $0x68] sm:$0xff]  ;;  %v1458_v45 = vld [vmem:[#allocation13 + $0x60] sm:$0xff] }
 0x1fa   : > { %v1016_v48 = vmax.f32 %v1015_v46, 0.0  ;;  %v1457_v46 = vld [vmem:[#allocation13 + $0x58] sm:$0xff] }
 0x1fc   : > { %v1021_v49 = vadd.f32 %v1958_v47, %v1016_v48  ;;  %v1456_v47 = vld [vmem:[#allocation13 + $0x50] sm:$0xff]  ;;  %v1455_v48 = vld [vmem:[#allocation13 + $0x48] sm:$0xff] }
 0x1fe   : > { %1042 = vmatpush.msrb.mxu2 %v1021_v49  ;;  %1075 = vmatpush.msra.mxu3 %v1021_v49 }
 0x1ff   : > { %1794 = vmatmul.msk.f32.vlgmr.msrb.gmra.mxu2 %vm1023_vm1, %v1022_v50  ;;  %1795 = vmatmul.msk.f32.vlgmr.msra.gmra.mxu3 %vm1023_vm1, %v1056_v51 }
 0x200   : > { %1156 = vmatpush.msra.mxu2 %v1021_v49  ;;  %1181 = vmatpush.msrb.mxu3 %v1169_v52 }
 0x202   : > { %1182 = vmatpush.msrb.mxu3 %v1168_v53  ;;  %v1961_v53 = vld [vmem:[%s2767_s3] ss:$0 sm:$0xff] }
 0x204   : > { %1183 = vmatpush.msrb.mxu3 %v1167_v54 }
 0x206   : > { %1184 = vmatpush.msrb.mxu3 %v1166_v58 }
 0x207   : > { %1798 = vmatmul.msk.f32.vlgmr.msra.gmra.mxu2 %vm1023_vm1, %v1137_v55 }
 0x208   : > { %1185 = vmatpush.msrb.mxu3 %v1165_v59  ;;  %v1391_v59 = vld [vmem:[%s2769_s9] sm:$0x1] }
 0x20a   : > { %1186 = vmatpush.msrb.mxu3 %v1164_v60  ;;  %v1813_v60 = vld [vmem:[%s2769_s9 + $0x1] sm:$0x1] }
 0x20c   : > { %1187 = vmatpush.msrb.mxu3 %v1163_v61  ;;  %v1818_v61 = vld [vmem:[%s2769_s9 + $0x2] sm:$0x1] }
 0x20e   : > { %1188 = vmatpush.msrb.mxu3 %v1162_v62  ;;  %v1427_v62 = vld [vmem:[#allocation13 + $0x38] sm:$0xff] }
 0x282   : > { %v1044_v63 = vpop.f32.mrf.mxu2  ;;  %v1077_v0 = vpop.f32.mrf.mxu3 }
 0x283   : > { %1796 = vmatmul.msk.f32.vlgmr.msra.gmra.mxu0 %vm1089_vm2, %v1077_v0  ;;  %1797 = vmatmul.msk.f32.vlgmr.msrb.gmra.mxu1 %vm1089_vm2, %v1044_v63  ;;  %v1541_v63 = vld [vmem:[#allocation13 + $0xb8] sm:$0xff]  ;;  %v1426_v0 = vld [vmem:[#allocation13 + $0x30] sm:$0xff] }
 0x28a   : > { %v1158_v1 = vpop.f32.mrf.mxu2 }
 0x28b   : > { %1799 = vmatmul.msk.f32.vlgmr.msrb.gmra.mxu3 %vm1089_vm2, %v1158_v1  ;;  %v1540_v1 = vld [vmem:[#allocation13 + $0xb0] sm:$0xff] }
 0x300   : > { %v1110_v6 = vpop.f32.mrf.mxu0  ;;  %v1133_v7 = vpop.f32.mrf.mxu1 }
 0x301   : > { %v1134_v8 = vadd.f32 %v1133_v7, %v1110_v6  ;;  %v1422_v6 = vld [vmem:[#allocation13 + $0x10] sm:$0xff]  ;;  %v1421_v7 = vld [vmem:[#allocation13 + $0x8] sm:$0xff] }
 0x30e   : > { %v1190_v10 = vpop.f32.mrf.mxu3 }
 0x30f   : > { %v1193_v11 = vadd.f32 %v1190_v10, %v1134_v8  ;;  %v1454_v8 = vld [vmem:[#allocation13 + $0x40] sm:$0xff] }
 0x310   : > { %v1538_v10 = vld [vmem:[#allocation13 + $0xa0] sm:$0xff] }
 0x311   : > { %v1198_v12 = vadd.f32 %v1959_v9, %v1193_v11  ;;  %v1420_v9 = vld [vmem:[#allocation13] sm:$0xff]  ;;  %v1537_v11 = vld [vmem:[#allocation13 + $0x98] sm:$0xff] }
 0x313   : > { %v1199_v14 = vmax.f32 %v1198_v12, 0.0  ;;  %v1579_v12 = vld [vmem:[#allocation14 + $0x38] sm:$0xff] }
 0x315   : > { %v1204_v15 = vadd.f32 %v1960_v13, %v1199_v14  ;;  %v1578_v13 = vld [vmem:[#allocation14 + $0x30] sm:$0xff] }
 0x316   : > { %v1536_v14 = vld [vmem:[#allocation13 + $0x90] sm:$0xff] }
 0x317   : > { %1800 = vmatpush.msk.msrb.mxu2 %vm1210_vm3, %v1204_v15  ;;  %1803 = vmatpush.msk.msrb.mxu0 %vm1210_vm3, %v1204_v15 }
 0x318   : > { %1808 = vmatpush.msk.msra.mxu3 %vm1210_vm3, %v1204_v15  ;;  %1801 = vmatmul.msk.f32.vlgmr.msrb.gmra.mxu2 %vm1206_vm4, %v1205_v16  ;;  %v1535_v15 = vld [vmem:[#allocation13 + $0x88] sm:$0xff]  ;;  %v1534_v16 = vld [vmem:[#allocation13 + $0x80] sm:$0xff] }
 0x319   : > { %1809 = vmatmul.msk.f32.vlgmr.msra.gmra.mxu3 %vm1206_vm4, %v1807_v17  ;;  %1804 = vmatmul.msk.f32.vlgmr.msrb.gmra.mxu0 %vm1206_vm4, %v1802_v18 }
 0x31a   : > { %1310 = vmatpush.msra.mxu2 %v1241_v19  ;;  %1367 = vmatpush.msra.mxu0 %v1355_v20  ;;  %v1577_v20 = vld [vmem:[#allocation14 + $0x28] sm:$0xff] }
 0x31c   : > { %1311 = vmatpush.msra.mxu2 %v1240_v21  ;;  %1368 = vmatpush.msra.mxu0 %v1354_v22  ;;  %v1576_v21 = vld [vmem:[#allocation14 + $0x20] sm:$0xff]  ;;  %v1575_v22 = vld [vmem:[#allocation14 + $0x18] sm:$0xff] }
 0x31e   : > { %1312 = vmatpush.msra.mxu2 %v1239_v23  ;;  %1369 = vmatpush.msra.mxu0 %v1353_v24  ;;  %v1574_v23 = vld [vmem:[#allocation14 + $0x10] sm:$0xff]  ;;  %v1573_v24 = vld [vmem:[#allocation14 + $0x8] sm:$0xff] }
 0x320   : > { %1313 = vmatpush.msra.mxu2 %v1238_v25  ;;  %1370 = vmatpush.msra.mxu0 %v1352_v31  ;;  %v1572_v25 = vld [vmem:[#allocation14] sm:$0xff] }
 0x322   : > { %1314 = vmatpush.msra.mxu2 %v1237_v26  ;;  %1371 = vmatpush.msra.mxu0 %v1351_v33  ;;  %v1569_v33 = vld [vmem:[%s2771_s15] sm:$0x1] }
 0x324   : > { %1315 = vmatpush.msra.mxu2 %v1236_v27  ;;  %1372 = vmatpush.msra.mxu0 %v1350_v35 }
 0x326   : > { %1316 = vmatpush.msra.mxu2 %v1235_v28  ;;  %1373 = vmatpush.msra.mxu0 %v1349_v37 }
 0x328   : > { %1317 = vmatpush.msra.mxu2 %v1234_v30  ;;  %1374 = vmatpush.msra.mxu0 %v1348_v38  ;;  %v1566_v30 = vld [vmem:[%s2770_s25] sm:$0x1]  ;;  %s2249_s25 = scalar_lea.hbm %s2248_s19, 1 }
 0x329   : > { %p2250_p1 = scmp.ne.s32.totalorder %s2248_s19, %s2249_s25  ;;  %p2255_p7 = scmp.lt.s32.totalorder %s2253_s24, %s2249_s25 }
 0x32a   : > { %1473 = vmatpush.msrb.mxu2 %v1461_v42 }
 0x32b   : > { %p2251_p3 = pnand %p2250_p1, %p2554_p4  ;;  %p2256_p8 = por %p2255_p7, %p2254_p12 }
 0x32c   : > { %1474 = vmatpush.msrb.mxu2 %v1460_v43 }
 0x32d   : > { %p2252_p5 = pneg %p2251_p3 }
 0x32e   : > { %1475 = vmatpush.msrb.mxu2 %v1459_v44 }
 0x32f   : > { %p2257_p9 = pnand %p2256_p8, %p2252_p5 }
 0x330   : > { %1476 = vmatpush.msrb.mxu2 %v1458_v45 }
 0x332   : > { %1477 = vmatpush.msrb.mxu2 %v1457_v46 }
 0x334   : > { %1478 = vmatpush.msrb.mxu2 %v1456_v47 }
 0x336   : > { %1479 = vmatpush.msrb.mxu2 %v1455_v48 }
 0x338   : > { %1480 = vmatpush.msrb.mxu2 %v1454_v8 }
 0x396   : > { %v1264_v39 = vpop.f32.mrf.mxu0 }
 0x397   : > { %1805 = vmatmul.msk.f32.vlgmr.msra.gmra.mxu1 %vm1089_vm2, %v1264_v39 }
 0x39b   : > { %v1231_v40 = vpop.f32.mrf.mxu2 }
 0x39c   : > { %1806 = vmatmul.msk.f32.vlgmr.msra.gmra.mxu2 %vm1089_vm2, %v1231_v40  ;;  %v1344_v41 = vpop.f32.mrf.mxu3 }
 0x39d   : > { %1810 = vmatmul.msk.f32.vlgmr.msra.gmra.mxu0 %vm1089_vm2, %v1344_v41 }
 0x414   : > { %v1296_v49 = vpop.f32.mrf.mxu1 }
 0x41a   : > { %v1376_v51 = vpop.f32.mrf.mxu0 }
 0x41f   : > { %v1319_v50 = vpop.f32.mrf.mxu2 }
 0x420   : > { %v1320_v52 = vadd.f32 %v1319_v50, %v1296_v49 }
 0x422   : > { %v1379_v54 = vadd.f32 %v1376_v51, %v1320_v52 }
 0x424   : > { %v1384_v55 = vadd.f32 %v1961_v53, %v1379_v54 }
 0x426   : > { %v1385_v57 = vmax.f32 %v1384_v55, 0.0 }
 0x428   : > { %v1390_v58 = vadd.f32 %v1962_v56, %v1385_v57 }
 0x42a   : > { %1811 = vmatpush.msk.msrb.mxu3 %vm1396_vm5, %v1390_v58  ;;  %1814 = vmatpush.msk.msrb.mxu1 %vm1396_vm5, %v1390_v58 }
 0x42b   : > { %1819 = vmatpush.msk.msrb.mxu0 %vm1396_vm5, %v1390_v58  ;;  %1812 = vmatmul.msk.f32.vlgmr.msrb.gmra.mxu3 %vm1392_vm6, %v1391_v59 }
 0x42c   : > { %1815 = vmatmul.msk.f32.vlgmr.msrb.gmra.mxu1 %vm1392_vm6, %v1813_v60  ;;  %1820 = vmatmul.msk.f32.vlgmr.msrb.gmra.mxu0 %vm1392_vm6, %v1818_v61 }
 0x42d   : > { %1496 = vmatpush.msra.mxu3 %v1427_v62  ;;  %1553 = vmatpush.msra.mxu1 %v1541_v63 }
 0x42e   : > { %1592 = vmatpush.msra.mxu0 %v1579_v12 }
 0x42f   : > { %1497 = vmatpush.msra.mxu3 %v1426_v0  ;;  %1554 = vmatpush.msra.mxu1 %v1540_v1 }
 0x430   : > { %1593 = vmatpush.msra.mxu0 %v1578_v13 }
 0x431   : > { %1498 = vmatpush.msra.mxu3 %v1425_v2  ;;  %1555 = vmatpush.msra.mxu1 %v1539_v3 }
 0x432   : > { %1594 = vmatpush.msra.mxu0 %v1577_v20 }
 0x433   : > { %1499 = vmatpush.msra.mxu3 %v1424_v4  ;;  %1556 = vmatpush.msra.mxu1 %v1538_v10 }
 0x434   : > { %1595 = vmatpush.msra.mxu0 %v1576_v21 }
 0x435   : > { %1500 = vmatpush.msra.mxu3 %v1423_v5  ;;  %1557 = vmatpush.msra.mxu1 %v1537_v11 }
 0x436   : > { %1596 = vmatpush.msra.mxu0 %v1575_v22 }
 0x437   : > { %1501 = vmatpush.msra.mxu3 %v1422_v6  ;;  %1558 = vmatpush.msra.mxu1 %v1536_v14 }
 0x438   : > { %1597 = vmatpush.msra.mxu0 %v1574_v23 }
 0x439   : > { %1502 = vmatpush.msra.mxu3 %v1421_v7  ;;  %1559 = vmatpush.msra.mxu1 %v1535_v15 }
 0x43a   : > { %1598 = vmatpush.msra.mxu0 %v1573_v24 }
 0x43b   : > { %1503 = vmatpush.msra.mxu3 %v1420_v9  ;;  %1560 = vmatpush.msra.mxu1 %v1534_v16 }
 0x43c   : > { %1599 = vmatpush.msra.mxu0 %v1572_v25 }
 0x4a9   : > { %v1450_v17 = vpop.f32.mrf.mxu1  ;;  %v1530_v18 = vpop.f32.mrf.mxu0 }
 0x4aa   : > { %1816 = vmatmul.msk.f32.vlgmr.msrb.gmra.mxu2 %vm1089_vm2, %v1450_v17  ;;  %1821 = vmatmul.msk.f32.vlgmr.msra.gmra.mxu1 %vm1089_vm2, %v1530_v18 }
 0x4ae   : > { %v1417_v19 = vpop.f32.mrf.mxu3 }
 0x4af   : > { %1817 = vmatmul.msk.f32.vlgmr.msra.gmra.mxu3 %vm1089_vm2, %v1417_v19 }
 0x527   : > { %v1562_v28 = vpop.f32.mrf.mxu1 }
 0x52d   : > { %v1482_v26 = vpop.f32.mrf.mxu2 }
 0x532   : > { %v1505_v27 = vpop.f32.mrf.mxu3 }
 0x533   : > { %v1506_v29 = vadd.f32 %v1505_v27, %v1482_v26 }
 0x535   : > { %v1565_v31 = vadd.f32 %v1562_v28, %v1506_v29 }
 0x537   : > { %v1567_v32 = vadd.f32 %v1566_v30, %v1565_v31 }
 0x539   : > { %v1568_v34 = vmax.f32 %v1567_v32, 0.0 }
 0x53b   : > { %v1570_v35 = vadd.f32 %v1569_v33, %v1568_v34 }
 0x53d   : > { %1822 = vmatmul.msk.f32.vlgmr.msra.gmra.mxu0 %vm1089_vm2, %v1570_v35 }
 0x5ba   : > { %v1601_v37 = vpop.f32.mrf.mxu0 }
 0x5bb   : > { %v1602_v38 = vadd.f32 %v1601_v37, %v1580_v36 }
 0x5bd   : > { %1604 = vst [vmem:[%s751_s10] sm:$0x1] %v1602_v38 }
 0x5be   : > { %2260 = shalt.err (!%p2257_p9)
}
 0x5bf   : > { %1860 = dma.vmem_to_hbm [thread:$0]  (%p2554_p4), %s1617_s14, 16, %s1619_s16, %s1606_s6  }
 0x5c0 PF: > { %s1630_s22 = sand.u32 1, %s2303_s0   ;;  %p2773_p10 = scmp.ge.s32.totalorder %s2315_s21, 2 }
 0x5c1   : > { %s1631_s11 = scalar_lea.sflag [#allocation4], %s1630_s22 }
 0x5c2   : > { %p1892_p13 = pnand %p2773_p10, %p2558_p6 }
 0x5c4   : > { %p1893_p11 = pneg %p1892_p13 }
 0x5c6   : > { %2298 = dma.done.wait (%p1893_p11), %s1631_s11, 16  }
 0x5c7   : > { %2300 = vsyncadd (%p1893_p11), %s1631_s11, 4294967280  ;;  %p36_p0 = scmp.ge.s32.totalorder %s2528_s27, 4   ;;  %s2774_s0 = smov %s2307_s30 }
 0x5c8   : > { %s2775_s30 = smov %s2311_s20  ;;  %s2776_s20 = smov %s2539_s23 }
 0x5c9   : > { %s2777_s21 = smov %s2528_s27  ;;  %38 = sbr.rel (!%p36_p0) target bundleno = 25 (0x19), region = 193 }
 0x5ce   :  { %1636 = vsyncpa [#allocation3], 1 }
 0x5cf   :  { %1638 = vsyncpa [#allocation3 + $0x1], 1 }
 0x5d0   :  { %1639 = vsyncpa [#allocation6], 1 }
 0x5d1   :  { %1640 = vsyncpa [#allocation9], 1 }
 0x5d2   :  { %1641 = vsyncpa [#allocation12], 1 }
 0x5d3   :  { %1642 = vsyncpa [#allocation15], 1 }
 0x5d4   :  { %1643 = vsyncpa [#allocation4], 1 }
 0x5d5   :  { %1645 = vsyncpa [#allocation4 + $0x1], 1 }

</bundles_post_ra>
